<compile_context>
chip_gen: v6e
topology: v6e:2x2x1
jax: 0.10.0
libtpu: 0.0.40
codegen_flags: <defaults>
</compile_context>

<pallas_src>
import jax
import jax.numpy as jnp
from jax import lax
from jax.experimental import pallas as pl
from jax.experimental.pallas import tpu as pltpu


def lstm_fc_kernel(x_ref, h0_ref, c0_ref, wih_ref, whh_ref, b_ref,
                   wfc_ref, bfc_ref, y_ref, h_out_ref, c_out_ref, hall_ref):
    """Whole-sequence LSTM + FC head, everything VMEM-resident.

    x_ref   : (B, T, F)   batch-first input
    h0_ref  : (B, H)      initial hidden   (aliased with h_out_ref)
    c0_ref  : (B, H)      initial cell     (aliased with c_out_ref)
    wih_ref : (F, 4H)     input->gates weight (pre-transposed)
    whh_ref : (H, 4H)     hidden->gates weight (pre-transposed)
    b_ref   : (1, 4H)     combined bias (b_ih + b_hh)
    wfc_ref : (H, 2)      fc weight (pre-transposed)
    bfc_ref : (1, 2)      fc bias
    y_ref   : (B, T, 2)   per-step fc output (batch-first)
    h_out_ref, c_out_ref : (B, H) final states
    hall_ref: (T, B, H)   scratch: all hidden states (off the critical path)
    """
    B, T, F = x_ref.shape
    H = h0_ref.shape[-1]
    G = 4 * H

    whh = whh_ref[...]                        # (H, 4H), lives in vregs
    wfc = wfc_ref[...]                        # (H, 2)

    # ---- hoisted input projection: one MXU matmul, bias folded in, no scratch.
    x_flat = x_ref[...].reshape(B * T, F)
    gx = jnp.dot(x_flat, wih_ref[...],
                 preferred_element_type=jnp.float32) + b_ref[...]
    gx = gx.reshape(B, T, G)                  # row b*T+t -> [b, t, :]

    # ---- per-lane activation constants (hoisted): sigmoid(x)=0.5*tanh(0.5x)+0.5
    # i/f/o lanes -> (scale=0.5, shift=0.5); g lanes [2H,3H) -> (1.0, 0.0).
    lane = lax.broadcasted_iota(jnp.int32, (B, G), 1)
    is_g = (lane >= 2 * H) & (lane < 3 * H)
    act_scale = jnp.where(is_g, 1.0, 0.5).astype(jnp.float32)   # (B, 4H)
    act_shift = jnp.where(is_g, 0.0, 0.5).astype(jnp.float32)   # (B, 4H)

    h = h0_ref[...]
    c = c0_ref[...]
    # NOTE: default (bf16-pass) matmul precision matches the 1e-4 tolerance at
    # H=32; bump precision on the hoisted matmuls if H grows.
    for t in range(T):                        # fully unrolled, static indices
        gates = gx[:, t, :] + jnp.dot(h, whh,
                                      preferred_element_type=jnp.float32)
        # single EUP pass over the full gate tile + cheap VPU affine
        act = jnp.tanh(gates * act_scale) * act_scale + act_shift
        i_g = act[:, 0 * H:1 * H]
        f_g = act[:, 1 * H:2 * H]
        g_g = act[:, 2 * H:3 * H]
        o_g = act[:, 3 * H:4 * H]
        c = f_g * c + i_g * g_g
        h = o_g * jnp.tanh(c)
        hall_ref[t] = h                       # store is off the recurrence path

    h_out_ref[...] = h
    c_out_ref[...] = c

    # ---- hoisted FC head: one matmul over all timesteps, then reorder to
    # batch-first with B static row-block stores (no wrapper transpose).
    feats = hall_ref[...].reshape(T * B, H)   # time-major rows (t*B + b)
    y_tm = jnp.dot(feats, wfc, preferred_element_type=jnp.float32) + bfc_ref[...]
    y_tm = y_tm.reshape(T, B, 2)
    for b in range(B):                        # B is small & static
        y_ref[b] = y_tm[:, b, :]              # (T, 2) for batch b


def ml_bandwidth_estimator(x, h, c, params):
    """x: (B, T, F) batch-first; h, c: (B, H). Returns (y (B,T,2), h_T, c_T)."""
    B, T, F = x.shape
    H = h.shape[-1]
    w_ih, w_hh, b_ih, b_hh, w_fc, b_fc = params

    # Weight-only prep (tiny, weight tensors only; activations go in untouched).
    wih_t = w_ih.T                               # (F, 4H)
    whh_t = w_hh.T                               # (H, 4H)
    b_sum = (b_ih + b_hh).reshape(1, 4 * H)      # combined bias
    wfc_t = w_fc.T                               # (H, 2)
    bfc_2d = b_fc.reshape(1, 2)

    vmem = pltpu.MemorySpace.VMEM
    y, h_out, c_out = pl.pallas_call(
        lstm_fc_kernel,
        out_shape=(
            jax.ShapeDtypeStruct((B, T, 2), jnp.float32),
            jax.ShapeDtypeStruct((B, H), jnp.float32),
            jax.ShapeDtypeStruct((B, H), jnp.float32),
        ),
        in_specs=[pl.BlockSpec(memory_space=vmem)] * 8,
        out_specs=(
            pl.BlockSpec(memory_space=vmem),
            pl.BlockSpec(memory_space=vmem),
            pl.BlockSpec(memory_space=vmem),
        ),
        scratch_shapes=[
            pltpu.VMEM((T, B, H), jnp.float32),   # all hidden states
        ],
        # h0 -> h_out, c0 -> c_out updated in place (no extra HBM round-trip).
        input_output_aliases={1: 1, 2: 2},
    )(x, h, c, wih_t, whh_t, b_sum, wfc_t, bfc_2d)
    return y, h_out, c_out


def reference_forward(x, h, c, params):
    """Pure-JAX reference matching torch.nn.LSTM(batch_first=True) + Linear."""
    w_ih, w_hh, b_ih, b_hh, w_fc, b_fc = params
    H = h.shape[-1]

    def step(carry, x_t):
        h_prev, c_prev = carry
        gates = x_t @ w_ih.T + b_ih + h_prev @ w_hh.T + b_hh
        i = jax.nn.sigmoid(gates[:, 0 * H:1 * H])
        f = jax.nn.sigmoid(gates[:, 1 * H:2 * H])
        g = jnp.tanh(gates[:, 2 * H:3 * H])
        o = jax.nn.sigmoid(gates[:, 3 * H:4 * H])
        c_new = f * c_prev + i * g
        h_new = o * jnp.tanh(c_new)
        return (h_new, c_new), h_new

    (h_fin, c_fin), feats = lax.scan(step, (h, c), jnp.transpose(x, (1, 0, 2)))
    feats = jnp.transpose(feats, (1, 0, 2))          # (B, T, H)
    y = feats @ w_fc.T + b_fc
    return y, h_fin, c_fin


def init_params(key, in_feat, hidden):
    """Deterministic init, PyTorch-style uniform(-1/sqrt(H), 1/sqrt(H))."""
    ks = jax.random.split(key, 6)
    bound = 1.0 / jnp.sqrt(hidden)
    u = lambda k, s: jax.random.uniform(k, s, jnp.float32, -bound, bound)
    w_ih = u(ks[0], (4 * hidden, in_feat))
    w_hh = u(ks[1], (4 * hidden, hidden))
    b_ih = u(ks[2], (4 * hidden,))
    b_hh = u(ks[3], (4 * hidden,))
    w_fc = u(ks[4], (2, hidden))
    b_fc = u(ks[5], (2,))
    return (w_ih, w_hh, b_ih, b_hh, w_fc, b_fc)


if __name__ == "__main__":
    B, T, F, H = 4, 8, 16, 32   # batch, seq, in_feat, hidden_size (small)

    key = jax.random.PRNGKey(0)
    k_x, k_h, k_c, k_p = jax.random.split(key, 4)
    x = jax.random.normal(k_x, (B, T, F), jnp.float32)
    h0 = jax.random.normal(k_h, (B, H), jnp.float32)
    c0 = jax.random.normal(k_c, (B, H), jnp.float32)
    params = init_params(k_p, F, H)

    y, h_out, c_out = jax.jit(ml_bandwidth_estimator)(x, h0, c0, params)
    jax.block_until_ready((y, h_out, c_out))

    y_ref, h_ref, c_ref = reference_forward(x, h0, c0, params)
    assert jnp.allclose(y, y_ref, atol=1e-4, rtol=1e-4)
    assert jnp.allclose(h_out, h_ref, atol=1e-4, rtol=1e-4)
    assert jnp.allclose(c_out, c_ref, atol=1e-4, rtol=1e-4)

    print("KERNEL_OK")
</pallas_src>

<mosaic_0001>
module attributes {stable_mosaic.version = 11 : i64} {
  func.func @lstm_fc_kernel(%arg0: memref<4x8x16xf32, #tpu.memory_space<vmem>>, %arg1: memref<4x32xf32, #tpu.memory_space<vmem>>, %arg2: memref<4x32xf32, #tpu.memory_space<vmem>>, %arg3: memref<16x128xf32, #tpu.memory_space<vmem>>, %arg4: memref<32x128xf32, #tpu.memory_space<vmem>>, %arg5: memref<1x128xf32, #tpu.memory_space<vmem>>, %arg6: memref<32x2xf32, #tpu.memory_space<vmem>>, %arg7: memref<1x2xf32, #tpu.memory_space<vmem>>, %arg8: memref<4x8x2xf32, #tpu.memory_space<vmem>>, %arg9: memref<4x32xf32, #tpu.memory_space<vmem>>, %arg10: memref<4x32xf32, #tpu.memory_space<vmem>>, %arg11: memref<8x4x32xf32, #tpu.memory_space<vmem>>) attributes {dimension_semantics = [], scalar_prefetch = 0 : i64, scratch_operands = 1 : i64, tpu.core_type = #tpu.core_type<tc>} {
    %c0 = arith.constant 0 : index
    %c0_0 = arith.constant 0 : index
    %0 = vector.load %arg4[%c0, %c0_0] : memref<32x128xf32, #tpu.memory_space<vmem>>, vector<32x128xf32>
    %c0_1 = arith.constant 0 : index
    %c0_2 = arith.constant 0 : index
    %1 = vector.load %arg6[%c0_1, %c0_2] : memref<32x2xf32, #tpu.memory_space<vmem>>, vector<32x2xf32>
    %c0_3 = arith.constant 0 : index
    %c0_4 = arith.constant 0 : index
    %c0_5 = arith.constant 0 : index
    %2 = vector.load %arg0[%c0_3, %c0_4, %c0_5] : memref<4x8x16xf32, #tpu.memory_space<vmem>>, vector<4x8x16xf32>
    %3 = vector.shape_cast %2 : vector<4x8x16xf32> to vector<32x16xf32>
    %c0_6 = arith.constant 0 : index
    %c0_7 = arith.constant 0 : index
    %4 = vector.load %arg3[%c0_6, %c0_7] : memref<16x128xf32, #tpu.memory_space<vmem>>, vector<16x128xf32>
    %cst = arith.constant dense<0.000000e+00> : vector<32x128xf32>
    %5 = tpu.matmul %3, %4, %cst {dimension_numbers = #tpu.dot_dimension_numbers<[1], [0], [0], [1], [0, 0, 1, 1], [], []>} : vector<32x16xf32>, vector<16x128xf32>, vector<32x128xf32> -> vector<32x128xf32>
    %c0_8 = arith.constant 0 : index
    %c0_9 = arith.constant 0 : index
    %6 = vector.load %arg5[%c0_8, %c0_9] : memref<1x128xf32, #tpu.memory_space<vmem>>, vector<1x128xf32>
    %7 = vector.broadcast %6 : vector<1x128xf32> to vector<32x128xf32>
    %8 = arith.addf %5, %7 : vector<32x128xf32>
    %9 = vector.shape_cast %8 : vector<32x128xf32> to vector<4x8x128xf32>
    %10 = tpu.iota {dimensions = array<i32: 1>} : vector<4x128xi32>
    %c64_i32 = arith.constant 64 : i32
    %11 = vector.broadcast %c64_i32 : i32 to vector<4x128xi32>
    %12 = arith.cmpi sge, %10, %11 : vector<4x128xi32>
    %c96_i32 = arith.constant 96 : i32
    %13 = vector.broadcast %c96_i32 : i32 to vector<4x128xi32>
    %14 = arith.cmpi slt, %10, %13 : vector<4x128xi32>
    %15 = arith.andi %12, %14 : vector<4x128xi1>
    %cst_10 = arith.constant 1.000000e+00 : f32
    %cst_11 = arith.constant 5.000000e-01 : f32
    %16 = vector.broadcast %cst_10 : f32 to vector<4x128xf32>
    %17 = vector.broadcast %cst_11 : f32 to vector<4x128xf32>
    %18 = arith.select %15, %16, %17 : vector<4x128xi1>, vector<4x128xf32>
    %cst_12 = arith.constant 0.000000e+00 : f32
    %cst_13 = arith.constant 5.000000e-01 : f32
    %19 = vector.broadcast %cst_12 : f32 to vector<4x128xf32>
    %20 = vector.broadcast %cst_13 : f32 to vector<4x128xf32>
    %21 = arith.select %15, %19, %20 : vector<4x128xi1>, vector<4x128xf32>
    %c0_14 = arith.constant 0 : index
    %c0_15 = arith.constant 0 : index
    %22 = vector.load %arg1[%c0_14, %c0_15] : memref<4x32xf32, #tpu.memory_space<vmem>>, vector<4x32xf32>
    %c0_16 = arith.constant 0 : index
    %c0_17 = arith.constant 0 : index
    %23 = vector.load %arg2[%c0_16, %c0_17] : memref<4x32xf32, #tpu.memory_space<vmem>>, vector<4x32xf32>
    %24 = vector.extract_strided_slice %9 {offsets = [0, 0, 0], sizes = [4, 1, 128], strides = [1, 1, 1]} : vector<4x8x128xf32> to vector<4x1x128xf32>
    %25 = vector.shape_cast %24 : vector<4x1x128xf32> to vector<4x128xf32>
    %cst_18 = arith.constant dense<0.000000e+00> : vector<4x128xf32>
    %26 = tpu.matmul %22, %0, %cst_18 {dimension_numbers = #tpu.dot_dimension_numbers<[1], [0], [0], [1], [0, 0, 1, 1], [], []>} : vector<4x32xf32>, vector<32x128xf32>, vector<4x128xf32> -> vector<4x128xf32>
    %27 = arith.addf %25, %26 : vector<4x128xf32>
    %28 = arith.mulf %27, %18 : vector<4x128xf32>
    %29 = math.tanh %28 : vector<4x128xf32>
    %30 = arith.mulf %29, %18 : vector<4x128xf32>
    %31 = arith.addf %30, %21 : vector<4x128xf32>
    %32 = vector.extract_strided_slice %31 {offsets = [0, 0], sizes = [4, 32], strides = [1, 1]} : vector<4x128xf32> to vector<4x32xf32>
    %33 = vector.extract_strided_slice %31 {offsets = [0, 32], sizes = [4, 32], strides = [1, 1]} : vector<4x128xf32> to vector<4x32xf32>
    %34 = vector.extract_strided_slice %31 {offsets = [0, 64], sizes = [4, 32], strides = [1, 1]} : vector<4x128xf32> to vector<4x32xf32>
    %35 = vector.extract_strided_slice %31 {offsets = [0, 96], sizes = [4, 32], strides = [1, 1]} : vector<4x128xf32> to vector<4x32xf32>
    %36 = arith.mulf %33, %23 : vector<4x32xf32>
    %37 = arith.mulf %32, %34 : vector<4x32xf32>
    %38 = arith.addf %36, %37 : vector<4x32xf32>
    %39 = math.tanh %38 : vector<4x32xf32>
    %40 = arith.mulf %35, %39 : vector<4x32xf32>
    %c0_19 = arith.constant 0 : index
    %c0_20 = arith.constant 0 : index
    %c0_21 = arith.constant 0 : index
    %41 = vector.load %arg11[%c0_19, %c0_20, %c0_21] : memref<8x4x32xf32, #tpu.memory_space<vmem>>, vector<1x4x32xf32>
    %42 = vector.shape_cast %41 : vector<1x4x32xf32> to vector<4x32xf32>
    %43 = vector.shape_cast %40 : vector<4x32xf32> to vector<1x4x32xf32>
    tpu.vector_store %arg11[%c0_19, %c0_20, %c0_21], %43 {strides = array<i32>} : memref<8x4x32xf32, #tpu.memory_space<vmem>>, vector<1x4x32xf32>,
    %44 = vector.extract_strided_slice %9 {offsets = [0, 1, 0], sizes = [4, 1, 128], strides = [1, 1, 1]} : vector<4x8x128xf32> to vector<4x1x128xf32>
    %45 = vector.shape_cast %44 : vector<4x1x128xf32> to vector<4x128xf32>
    %cst_22 = arith.constant dense<0.000000e+00> : vector<4x128xf32>
    %46 = tpu.matmul %40, %0, %cst_22 {dimension_numbers = #tpu.dot_dimension_numbers<[1], [0], [0], [1], [0, 0, 1, 1], [], []>} : vector<4x32xf32>, vector<32x128xf32>, vector<4x128xf32> -> vector<4x128xf32>
    %47 = arith.addf %45, %46 : vector<4x128xf32>
    %48 = arith.mulf %47, %18 : vector<4x128xf32>
    %49 = math.tanh %48 : vector<4x128xf32>
    %50 = arith.mulf %49, %18 : vector<4x128xf32>
    %51 = arith.addf %50, %21 : vector<4x128xf32>
    %52 = vector.extract_strided_slice %51 {offsets = [0, 0], sizes = [4, 32], strides = [1, 1]} : vector<4x128xf32> to vector<4x32xf32>
    %53 = vector.extract_strided_slice %51 {offsets = [0, 32], sizes = [4, 32], strides = [1, 1]} : vector<4x128xf32> to vector<4x32xf32>
    %54 = vector.extract_strided_slice %51 {offsets = [0, 64], sizes = [4, 32], strides = [1, 1]} : vector<4x128xf32> to vector<4x32xf32>
    %55 = vector.extract_strided_slice %51 {offsets = [0, 96], sizes = [4, 32], strides = [1, 1]} : vector<4x128xf32> to vector<4x32xf32>
    %56 = arith.mulf %53, %38 : vector<4x32xf32>
    %57 = arith.mulf %52, %54 : vector<4x32xf32>
    %58 = arith.addf %56, %57 : vector<4x32xf32>
    %59 = math.tanh %58 : vector<4x32xf32>
    %60 = arith.mulf %55, %59 : vector<4x32xf32>
    %c1 = arith.constant 1 : index
    %c0_23 = arith.constant 0 : index
    %c0_24 = arith.constant 0 : index
    %61 = vector.load %arg11[%c1, %c0_23, %c0_24] : memref<8x4x32xf32, #tpu.memory_space<vmem>>, vector<1x4x32xf32>
    %62 = vector.shape_cast %61 : vector<1x4x32xf32> to vector<4x32xf32>
    %63 = vector.shape_cast %60 : vector<4x32xf32> to vector<1x4x32xf32>
    tpu.vector_store %arg11[%c1, %c0_23, %c0_24], %63 {strides = array<i32>} : memref<8x4x32xf32, #tpu.memory_space<vmem>>, vector<1x4x32xf32>,
    %64 = vector.extract_strided_slice %9 {offsets = [0, 2, 0], sizes = [4, 1, 128], strides = [1, 1, 1]} : vector<4x8x128xf32> to vector<4x1x128xf32>
    %65 = vector.shape_cast %64 : vector<4x1x128xf32> to vector<4x128xf32>
    %cst_25 = arith.constant dense<0.000000e+00> : vector<4x128xf32>
    %66 = tpu.matmul %60, %0, %cst_25 {dimension_numbers = #tpu.dot_dimension_numbers<[1], [0], [0], [1], [0, 0, 1, 1], [], []>} : vector<4x32xf32>, vector<32x128xf32>, vector<4x128xf32> -> vector<4x128xf32>
    %67 = arith.addf %65, %66 : vector<4x128xf32>
    %68 = arith.mulf %67, %18 : vector<4x128xf32>
    %69 = math.tanh %68 : vector<4x128xf32>
    %70 = arith.mulf %69, %18 : vector<4x128xf32>
    %71 = arith.addf %70, %21 : vector<4x128xf32>
    %72 = vector.extract_strided_slice %71 {offsets = [0, 0], sizes = [4, 32], strides = [1, 1]} : vector<4x128xf32> to vector<4x32xf32>
    %73 = vector.extract_strided_slice %71 {offsets = [0, 32], sizes = [4, 32], strides = [1, 1]} : vector<4x128xf32> to vector<4x32xf32>
    %74 = vector.extract_strided_slice %71 {offsets = [0, 64], sizes = [4, 32], strides = [1, 1]} : vector<4x128xf32> to vector<4x32xf32>
    %75 = vector.extract_strided_slice %71 {offsets = [0, 96], sizes = [4, 32], strides = [1, 1]} : vector<4x128xf32> to vector<4x32xf32>
    %76 = arith.mulf %73, %58 : vector<4x32xf32>
    %77 = arith.mulf %72, %74 : vector<4x32xf32>
    %78 = arith.addf %76, %77 : vector<4x32xf32>
    %79 = math.tanh %78 : vector<4x32xf32>
    %80 = arith.mulf %75, %79 : vector<4x32xf32>
    %c2 = arith.constant 2 : index
    %c0_26 = arith.constant 0 : index
    %c0_27 = arith.constant 0 : index
    %81 = vector.load %arg11[%c2, %c0_26, %c0_27] : memref<8x4x32xf32, #tpu.memory_space<vmem>>, vector<1x4x32xf32>
    %82 = vector.shape_cast %81 : vector<1x4x32xf32> to vector<4x32xf32>
    %83 = vector.shape_cast %80 : vector<4x32xf32> to vector<1x4x32xf32>
    tpu.vector_store %arg11[%c2, %c0_26, %c0_27], %83 {strides = array<i32>} : memref<8x4x32xf32, #tpu.memory_space<vmem>>, vector<1x4x32xf32>,
    %84 = vector.extract_strided_slice %9 {offsets = [0, 3, 0], sizes = [4, 1, 128], strides = [1, 1, 1]} : vector<4x8x128xf32> to vector<4x1x128xf32>
    %85 = vector.shape_cast %84 : vector<4x1x128xf32> to vector<4x128xf32>
    %cst_28 = arith.constant dense<0.000000e+00> : vector<4x128xf32>
    %86 = tpu.matmul %80, %0, %cst_28 {dimension_numbers = #tpu.dot_dimension_numbers<[1], [0], [0], [1], [0, 0, 1, 1], [], []>} : vector<4x32xf32>, vector<32x128xf32>, vector<4x128xf32> -> vector<4x128xf32>
    %87 = arith.addf %85, %86 : vector<4x128xf32>
    %88 = arith.mulf %87, %18 : vector<4x128xf32>
    %89 = math.tanh %88 : vector<4x128xf32>
    %90 = arith.mulf %89, %18 : vector<4x128xf32>
    %91 = arith.addf %90, %21 : vector<4x128xf32>
    %92 = vector.extract_strided_slice %91 {offsets = [0, 0], sizes = [4, 32], strides = [1, 1]} : vector<4x128xf32> to vector<4x32xf32>
    %93 = vector.extract_strided_slice %91 {offsets = [0, 32], sizes = [4, 32], strides = [1, 1]} : vector<4x128xf32> to vector<4x32xf32>
    %94 = vector.extract_strided_slice %91 {offsets = [0, 64], sizes = [4, 32], strides = [1, 1]} : vector<4x128xf32> to vector<4x32xf32>
    %95 = vector.extract_strided_slice %91 {offsets = [0, 96], sizes = [4, 32], strides = [1, 1]} : vector<4x128xf32> to vector<4x32xf32>
    %96 = arith.mulf %93, %78 : vector<4x32xf32>
    %97 = arith.mulf %92, %94 : vector<4x32xf32>
    %98 = arith.addf %96, %97 : vector<4x32xf32>
    %99 = math.tanh %98 : vector<4x32xf32>
    %100 = arith.mulf %95, %99 : vector<4x32xf32>
    %c3 = arith.constant 3 : index
    %c0_29 = arith.constant 0 : index
    %c0_30 = arith.constant 0 : index
    %101 = vector.load %arg11[%c3, %c0_29, %c0_30] : memref<8x4x32xf32, #tpu.memory_space<vmem>>, vector<1x4x32xf32>
    %102 = vector.shape_cast %101 : vector<1x4x32xf32> to vector<4x32xf32>
    %103 = vector.shape_cast %100 : vector<4x32xf32> to vector<1x4x32xf32>
    tpu.vector_store %arg11[%c3, %c0_29, %c0_30], %103 {strides = array<i32>} : memref<8x4x32xf32, #tpu.memory_space<vmem>>, vector<1x4x32xf32>,
    %104 = vector.extract_strided_slice %9 {offsets = [0, 4, 0], sizes = [4, 1, 128], strides = [1, 1, 1]} : vector<4x8x128xf32> to vector<4x1x128xf32>
    %105 = vector.shape_cast %104 : vector<4x1x128xf32> to vector<4x128xf32>
    %cst_31 = arith.constant dense<0.000000e+00> : vector<4x128xf32>
    %106 = tpu.matmul %100, %0, %cst_31 {dimension_numbers = #tpu.dot_dimension_numbers<[1], [0], [0], [1], [0, 0, 1, 1], [], []>} : vector<4x32xf32>, vector<32x128xf32>, vector<4x128xf32> -> vector<4x128xf32>
    %107 = arith.addf %105, %106 : vector<4x128xf32>
    %108 = arith.mulf %107, %18 : vector<4x128xf32>
    %109 = math.tanh %108 : vector<4x128xf32>
    %110 = arith.mulf %109, %18 : vector<4x128xf32>
    %111 = arith.addf %110, %21 : vector<4x128xf32>
    %112 = vector.extract_strided_slice %111 {offsets = [0, 0], sizes = [4, 32], strides = [1, 1]} : vector<4x128xf32> to vector<4x32xf32>
    %113 = vector.extract_strided_slice %111 {offsets = [0, 32], sizes = [4, 32], strides = [1, 1]} : vector<4x128xf32> to vector<4x32xf32>
    %114 = vector.extract_strided_slice %111 {offsets = [0, 64], sizes = [4, 32], strides = [1, 1]} : vector<4x128xf32> to vector<4x32xf32>
    %115 = vector.extract_strided_slice %111 {offsets = [0, 96], sizes = [4, 32], strides = [1, 1]} : vector<4x128xf32> to vector<4x32xf32>
    %116 = arith.mulf %113, %98 : vector<4x32xf32>
    %117 = arith.mulf %112, %114 : vector<4x32xf32>
    %118 = arith.addf %116, %117 : vector<4x32xf32>
    %119 = math.tanh %118 : vector<4x32xf32>
    %120 = arith.mulf %115, %119 : vector<4x32xf32>
    %c4 = arith.constant 4 : index
    %c0_32 = arith.constant 0 : index
    %c0_33 = arith.constant 0 : index
    %121 = vector.load %arg11[%c4, %c0_32, %c0_33] : memref<8x4x32xf32, #tpu.memory_space<vmem>>, vector<1x4x32xf32>
    %122 = vector.shape_cast %121 : vector<1x4x32xf32> to vector<4x32xf32>
    %123 = vector.shape_cast %120 : vector<4x32xf32> to vector<1x4x32xf32>
    tpu.vector_store %arg11[%c4, %c0_32, %c0_33], %123 {strides = array<i32>} : memref<8x4x32xf32, #tpu.memory_space<vmem>>, vector<1x4x32xf32>,
    %124 = vector.extract_strided_slice %9 {offsets = [0, 5, 0], sizes = [4, 1, 128], strides = [1, 1, 1]} : vector<4x8x128xf32> to vector<4x1x128xf32>
    %125 = vector.shape_cast %124 : vector<4x1x128xf32> to vector<4x128xf32>
    %cst_34 = arith.constant dense<0.000000e+00> : vector<4x128xf32>
    %126 = tpu.matmul %120, %0, %cst_34 {dimension_numbers = #tpu.dot_dimension_numbers<[1], [0], [0], [1], [0, 0, 1, 1], [], []>} : vector<4x32xf32>, vector<32x128xf32>, vector<4x128xf32> -> vector<4x128xf32>
    %127 = arith.addf %125, %126 : vector<4x128xf32>
    %128 = arith.mulf %127, %18 : vector<4x128xf32>
    %129 = math.tanh %128 : vector<4x128xf32>
    %130 = arith.mulf %129, %18 : vector<4x128xf32>
    %131 = arith.addf %130, %21 : vector<4x128xf32>
    %132 = vector.extract_strided_slice %131 {offsets = [0, 0], sizes = [4, 32], strides = [1, 1]} : vector<4x128xf32> to vector<4x32xf32>
    %133 = vector.extract_strided_slice %131 {offsets = [0, 32], sizes = [4, 32], strides = [1, 1]} : vector<4x128xf32> to vector<4x32xf32>
    %134 = vector.extract_strided_slice %131 {offsets = [0, 64], sizes = [4, 32], strides = [1, 1]} : vector<4x128xf32> to vector<4x32xf32>
    %135 = vector.extract_strided_slice %131 {offsets = [0, 96], sizes = [4, 32], strides = [1, 1]} : vector<4x128xf32> to vector<4x32xf32>
    %136 = arith.mulf %133, %118 : vector<4x32xf32>
    %137 = arith.mulf %132, %134 : vector<4x32xf32>
    %138 = arith.addf %136, %137 : vector<4x32xf32>
    %139 = math.tanh %138 : vector<4x32xf32>
    %140 = arith.mulf %135, %139 : vector<4x32xf32>
    %c5 = arith.constant 5 : index
    %c0_35 = arith.constant 0 : index
    %c0_36 = arith.constant 0 : index
    %141 = vector.load %arg11[%c5, %c0_35, %c0_36] : memref<8x4x32xf32, #tpu.memory_space<vmem>>, vector<1x4x32xf32>
    %142 = vector.shape_cast %141 : vector<1x4x32xf32> to vector<4x32xf32>
    %143 = vector.shape_cast %140 : vector<4x32xf32> to vector<1x4x32xf32>
    tpu.vector_store %arg11[%c5, %c0_35, %c0_36], %143 {strides = array<i32>} : memref<8x4x32xf32, #tpu.memory_space<vmem>>, vector<1x4x32xf32>,
    %144 = vector.extract_strided_slice %9 {offsets = [0, 6, 0], sizes = [4, 1, 128], strides = [1, 1, 1]} : vector<4x8x128xf32> to vector<4x1x128xf32>
    %145 = vector.shape_cast %144 : vector<4x1x128xf32> to vector<4x128xf32>
    %cst_37 = arith.constant dense<0.000000e+00> : vector<4x128xf32>
    %146 = tpu.matmul %140, %0, %cst_37 {dimension_numbers = #tpu.dot_dimension_numbers<[1], [0], [0], [1], [0, 0, 1, 1], [], []>} : vector<4x32xf32>, vector<32x128xf32>, vector<4x128xf32> -> vector<4x128xf32>
    %147 = arith.addf %145, %146 : vector<4x128xf32>
    %148 = arith.mulf %147, %18 : vector<4x128xf32>
    %149 = math.tanh %148 : vector<4x128xf32>
    %150 = arith.mulf %149, %18 : vector<4x128xf32>
    %151 = arith.addf %150, %21 : vector<4x128xf32>
    %152 = vector.extract_strided_slice %151 {offsets = [0, 0], sizes = [4, 32], strides = [1, 1]} : vector<4x128xf32> to vector<4x32xf32>
    %153 = vector.extract_strided_slice %151 {offsets = [0, 32], sizes = [4, 32], strides = [1, 1]} : vector<4x128xf32> to vector<4x32xf32>
    %154 = vector.extract_strided_slice %151 {offsets = [0, 64], sizes = [4, 32], strides = [1, 1]} : vector<4x128xf32> to vector<4x32xf32>
    %155 = vector.extract_strided_slice %151 {offsets = [0, 96], sizes = [4, 32], strides = [1, 1]} : vector<4x128xf32> to vector<4x32xf32>
    %156 = arith.mulf %153, %138 : vector<4x32xf32>
    %157 = arith.mulf %152, %154 : vector<4x32xf32>
    %158 = arith.addf %156, %157 : vector<4x32xf32>
    %159 = math.tanh %158 : vector<4x32xf32>
    %160 = arith.mulf %155, %159 : vector<4x32xf32>
    %c6 = arith.constant 6 : index
    %c0_38 = arith.constant 0 : index
    %c0_39 = arith.constant 0 : index
    %161 = vector.load %arg11[%c6, %c0_38, %c0_39] : memref<8x4x32xf32, #tpu.memory_space<vmem>>, vector<1x4x32xf32>
    %162 = vector.shape_cast %161 : vector<1x4x32xf32> to vector<4x32xf32>
    %163 = vector.shape_cast %160 : vector<4x32xf32> to vector<1x4x32xf32>
    tpu.vector_store %arg11[%c6, %c0_38, %c0_39], %163 {strides = array<i32>} : memref<8x4x32xf32, #tpu.memory_space<vmem>>, vector<1x4x32xf32>,
    %164 = vector.extract_strided_slice %9 {offsets = [0, 7, 0], sizes = [4, 1, 128], strides = [1, 1, 1]} : vector<4x8x128xf32> to vector<4x1x128xf32>
    %165 = vector.shape_cast %164 : vector<4x1x128xf32> to vector<4x128xf32>
    %cst_40 = arith.constant dense<0.000000e+00> : vector<4x128xf32>
    %166 = tpu.matmul %160, %0, %cst_40 {dimension_numbers = #tpu.dot_dimension_numbers<[1], [0], [0], [1], [0, 0, 1, 1], [], []>} : vector<4x32xf32>, vector<32x128xf32>, vector<4x128xf32> -> vector<4x128xf32>
    %167 = arith.addf %165, %166 : vector<4x128xf32>
    %168 = arith.mulf %167, %18 : vector<4x128xf32>
    %169 = math.tanh %168 : vector<4x128xf32>
    %170 = arith.mulf %169, %18 : vector<4x128xf32>
    %171 = arith.addf %170, %21 : vector<4x128xf32>
    %172 = vector.extract_strided_slice %171 {offsets = [0, 0], sizes = [4, 32], strides = [1, 1]} : vector<4x128xf32> to vector<4x32xf32>
    %173 = vector.extract_strided_slice %171 {offsets = [0, 32], sizes = [4, 32], strides = [1, 1]} : vector<4x128xf32> to vector<4x32xf32>
    %174 = vector.extract_strided_slice %171 {offsets = [0, 64], sizes = [4, 32], strides = [1, 1]} : vector<4x128xf32> to vector<4x32xf32>
    %175 = vector.extract_strided_slice %171 {offsets = [0, 96], sizes = [4, 32], strides = [1, 1]} : vector<4x128xf32> to vector<4x32xf32>
    %176 = arith.mulf %173, %158 : vector<4x32xf32>
    %177 = arith.mulf %172, %174 : vector<4x32xf32>
    %178 = arith.addf %176, %177 : vector<4x32xf32>
    %179 = math.tanh %178 : vector<4x32xf32>
    %180 = arith.mulf %175, %179 : vector<4x32xf32>
    %c7 = arith.constant 7 : index
    %c0_41 = arith.constant 0 : index
    %c0_42 = arith.constant 0 : index
    %181 = vector.load %arg11[%c7, %c0_41, %c0_42] : memref<8x4x32xf32, #tpu.memory_space<vmem>>, vector<1x4x32xf32>
    %182 = vector.shape_cast %181 : vector<1x4x32xf32> to vector<4x32xf32>
    %183 = vector.shape_cast %180 : vector<4x32xf32> to vector<1x4x32xf32>
    tpu.vector_store %arg11[%c7, %c0_41, %c0_42], %183 {strides = array<i32>} : memref<8x4x32xf32, #tpu.memory_space<vmem>>, vector<1x4x32xf32>,
    %c0_43 = arith.constant 0 : index
    %c0_44 = arith.constant 0 : index
    %184 = vector.load %arg9[%c0_43, %c0_44] : memref<4x32xf32, #tpu.memory_space<vmem>>, vector<4x32xf32>
    tpu.vector_store %arg9[%c0_43, %c0_44], %180 {strides = array<i32>} : memref<4x32xf32, #tpu.memory_space<vmem>>, vector<4x32xf32>,
    %c0_45 = arith.constant 0 : index
    %c0_46 = arith.constant 0 : index
    %185 = vector.load %arg10[%c0_45, %c0_46] : memref<4x32xf32, #tpu.memory_space<vmem>>, vector<4x32xf32>
    tpu.vector_store %arg10[%c0_45, %c0_46], %178 {strides = array<i32>} : memref<4x32xf32, #tpu.memory_space<vmem>>, vector<4x32xf32>,
    %c0_47 = arith.constant 0 : index
    %c0_48 = arith.constant 0 : index
    %c0_49 = arith.constant 0 : index
    %186 = vector.load %arg11[%c0_47, %c0_48, %c0_49] : memref<8x4x32xf32, #tpu.memory_space<vmem>>, vector<8x4x32xf32>
    %187 = vector.shape_cast %186 : vector<8x4x32xf32> to vector<32x32xf32>
    %cst_50 = arith.constant dense<0.000000e+00> : vector<32x2xf32>
    %188 = tpu.matmul %187, %1, %cst_50 {dimension_numbers = #tpu.dot_dimension_numbers<[1], [0], [0], [1], [0, 0, 1, 1], [], []>} : vector<32x32xf32>, vector<32x2xf32>, vector<32x2xf32> -> vector<32x2xf32>
    %c0_51 = arith.constant 0 : index
    %c0_52 = arith.constant 0 : index
    %189 = vector.load %arg7[%c0_51, %c0_52] : memref<1x2xf32, #tpu.memory_space<vmem>>, vector<1x2xf32>
    %190 = vector.broadcast %189 : vector<1x2xf32> to vector<32x2xf32>
    %191 = arith.addf %188, %190 : vector<32x2xf32>
    %192 = vector.shape_cast %191 : vector<32x2xf32> to vector<8x4x2xf32>
    %193 = vector.extract_strided_slice %192 {offsets = [0, 0, 0], sizes = [8, 1, 2], strides = [1, 1, 1]} : vector<8x4x2xf32> to vector<8x1x2xf32>
    %194 = vector.shape_cast %193 : vector<8x1x2xf32> to vector<8x2xf32>
    %c0_53 = arith.constant 0 : index
    %c0_54 = arith.constant 0 : index
    %c0_55 = arith.constant 0 : index
    %195 = vector.load %arg8[%c0_53, %c0_54, %c0_55] : memref<4x8x2xf32, #tpu.memory_space<vmem>>, vector<1x8x2xf32>
    %196 = vector.shape_cast %195 : vector<1x8x2xf32> to vector<8x2xf32>
    %197 = vector.shape_cast %194 : vector<8x2xf32> to vector<1x8x2xf32>
    tpu.vector_store %arg8[%c0_53, %c0_54, %c0_55], %197 {strides = array<i32>} : memref<4x8x2xf32, #tpu.memory_space<vmem>>, vector<1x8x2xf32>,
    %198 = vector.extract_strided_slice %192 {offsets = [0, 1, 0], sizes = [8, 1, 2], strides = [1, 1, 1]} : vector<8x4x2xf32> to vector<8x1x2xf32>
    %199 = vector.shape_cast %198 : vector<8x1x2xf32> to vector<8x2xf32>
    %c1_56 = arith.constant 1 : index
    %c0_57 = arith.constant 0 : index
    %c0_58 = arith.constant 0 : index
    %200 = vector.load %arg8[%c1_56, %c0_57, %c0_58] : memref<4x8x2xf32, #tpu.memory_space<vmem>>, vector<1x8x2xf32>
    %201 = vector.shape_cast %200 : vector<1x8x2xf32> to vector<8x2xf32>
    %202 = vector.shape_cast %199 : vector<8x2xf32> to vector<1x8x2xf32>
    tpu.vector_store %arg8[%c1_56, %c0_57, %c0_58], %202 {strides = array<i32>} : memref<4x8x2xf32, #tpu.memory_space<vmem>>, vector<1x8x2xf32>,
    %203 = vector.extract_strided_slice %192 {offsets = [0, 2, 0], sizes = [8, 1, 2], strides = [1, 1, 1]} : vector<8x4x2xf32> to vector<8x1x2xf32>
    %204 = vector.shape_cast %203 : vector<8x1x2xf32> to vector<8x2xf32>
    %c2_59 = arith.constant 2 : index
    %c0_60 = arith.constant 0 : index
    %c0_61 = arith.constant 0 : index
    %205 = vector.load %arg8[%c2_59, %c0_60, %c0_61] : memref<4x8x2xf32, #tpu.memory_space<vmem>>, vector<1x8x2xf32>
    %206 = vector.shape_cast %205 : vector<1x8x2xf32> to vector<8x2xf32>
    %207 = vector.shape_cast %204 : vector<8x2xf32> to vector<1x8x2xf32>
    tpu.vector_store %arg8[%c2_59, %c0_60, %c0_61], %207 {strides = array<i32>} : memref<4x8x2xf32, #tpu.memory_space<vmem>>, vector<1x8x2xf32>,
    %208 = vector.extract_strided_slice %192 {offsets = [0, 3, 0], sizes = [8, 1, 2], strides = [1, 1, 1]} : vector<8x4x2xf32> to vector<8x1x2xf32>
    %209 = vector.shape_cast %208 : vector<8x1x2xf32> to vector<8x2xf32>
    %c3_62 = arith.constant 3 : index
    %c0_63 = arith.constant 0 : index
    %c0_64 = arith.constant 0 : index
    %210 = vector.load %arg8[%c3_62, %c0_63, %c0_64] : memref<4x8x2xf32, #tpu.memory_space<vmem>>, vector<1x8x2xf32>
    %211 = vector.shape_cast %210 : vector<1x8x2xf32> to vector<8x2xf32>
    %212 = vector.shape_cast %209 : vector<8x2xf32> to vector<1x8x2xf32>
    tpu.vector_store %arg8[%c3_62, %c0_63, %c0_64], %212 {strides = array<i32>} : memref<4x8x2xf32, #tpu.memory_space<vmem>>, vector<1x8x2xf32>,
    return
  }
}

</mosaic_0001>

<bundles_post_ra>
// kernel: ml_bandwidth_estimator.1
= control target key start
LH: loop header
LB: loop body
LE: loop exit
PB: predicated region body
PF: predicated region fallthrough
CT: control target
= control target key end

     0   :  { %16 = vsyncpa [#allocation4], 0  ;;  %s2515_s13 = smov [#allocation3]   ;;  %s3322_s0 = inlined_call_operand.vmem [shape: f32[4,8,16], index: 0, kind: input, shape index: {}]   ;;  %s3323_s1 = inlined_call_operand.vmem [shape: f32[4,32], index: 1, kind: input, shape index: {}, may-alias: {1,9}]   ;;  %s3324_s2 = inlined_call_operand.vmem [shape: f32[4,32], index: 2, kind: input, shape index: {}, may-alias: {2,10}]   ;;  %s3325_s3 = inlined_call_operand.hbm [shape: f32[16,128], index: 3, kind: input, shape index: {}]   ;;  %s3326_s4 = inlined_call_operand.vmem [shape: f32[32,128], index: 4, kind: input, shape index: {}]   ;;  %s3327_s5 = inlined_call_operand.vmem [shape: f32[1,128], index: 5, kind: input, shape index: {}]   ;;  %s3328_s6 = inlined_call_operand.vmem [shape: f32[32,2], index: 6, kind: input, shape index: {}]   ;;  %s3329_s7 = inlined_call_operand.vmem [shape: f32[1,2], index: 7, kind: input, shape index: {}]   ;;  %s3330_s8 = inlined_call_operand.vmem [shape: f32[4,8,2], index: 8, kind: output, shape index: {0}]   ;;  %s3331_s9 = inlined_call_operand.vmem [shape: f32[4,32], index: 9, kind: output, shape index: {1}, may-alias: {1,9}]   ;;  %s3332_s10 = inlined_call_operand.vmem [shape: f32[4,32], index: 10, kind: output, shape index: {2}, may-alias: {2,10}]  }
   0x1   :  { %s28_s14 = sshll.u32 %s2515_s13, 4  ;;  %s29_s14 = int_to_ptr.vmem [resolvable:$true] %s28_s14 }
   0x2   :  { %s2501_s15 = scalar_lea.vmem %s29_s14, 256  ;;  %p2506_p1 = scmp.lt.s32.totalorder %s29_s14, %s29_s14 }
   0x3   :  { %p2502_p0 = scmp.ne.s32.totalorder %s29_s14, %s2501_s15  ;;  %p2507_p2 = scmp.lt.s32.totalorder %s2501_s15, %s2501_s15 }
   0x5   :  { %p2508_p3 = por %p2507_p2, %p2506_p1 }
   0x7   :  { %p2509_p4 = pnand %p2508_p3, %p2502_p0 }
   0x9   :  { %2512 = shalt.err (!%p2509_p4)
}
   0xa   :  { %s2516_s16 = smov 128   ;;  %s2517_s17 = smov 8  }
   0xb   :  { %34 = dma.hbm_to_vmem [thread:$0]  %s3325_s3, 256, %s29_s14, [#allocation4], %s2516_s16, %s2516_s16, %s2517_s17  }
   0xc   :  { %2513 = dma.done.wait [#allocation4], 256  }
   0xd   :  { %2514 = vsyncadd [#allocation4], 4294967040  ;;  %v2518_v0 = vmov 0.0   ;;  %vm2519_vm0 = vmmov 0   ;;  %v59_v1 = vld [vmem:[#allocation3 + $0x8] sm:$0xff]  ;;  %v2588_v2 = vld [vmem:[%s3326_s4 + $0x18] sm:$0xff]  ;;  %v165_v12 = vlaneseq }
   0xe   :  { %2246 = vmatprep.subr.mxu1 %v2518_v0  ;;  %2254 = vmatprep.mubr.msk.f32.mxu1 %vm2519_vm0, %v2518_v0  ;;  %v58_v3 = vld [vmem:[#allocation3] sm:$0xff]  ;;  %v2594_v4 = vld [vmem:[%s3326_s4 + $0x10] sm:$0xff]  ;;  %vm67_vm1 = vcmask 130048   ;;  %v55_v6 = vld [vmem:[%s3322_s0 + $0x8] sm:$0xff]  ;;  %vm174_vm2 = vcmask 261120   ;;  %v2520_v19 = vmov 0.5  }
   0xf   :  { %2236 = vmatprep.subr.mxu0 %v59_v1  ;;  %2247 = vmatpush3.msra.mxu1 %v2588_v2  ;;  %v54_v5 = vld [vmem:[%s3322_s0] sm:$0xff]  ;;  %v2607_v7 = vld [vmem:[%s3326_s4 + $0x8] sm:$0xff]  ;;  %v56_v8 = vld [vmem:[%s3322_s0 + $0x10] sm:$0xff]  ;;  %v166_v13 = vand.u32 127, %v165_v12  ;;  %s2522_s19 = smov 32   ;;  %vm365_vm6 = vcmask 1041409  }
  0x10   :  { %2237 = vmatpush3.msra.mxu0 %v59_v1  ;;  %2248 = vmatprep.subr.mxu1 %v2518_v0  ;;  %v2618_v9 = vld [vmem:[%s3326_s4] sm:$0xff]  ;;  %v57_v11 = vld [vmem:[%s3322_s0 + $0x18] sm:$0xff]  ;;  %vm368_vm7 = vcmask 1042434   ;;  %vm371_vm8 = vcmask 1043459   ;;  %vm376_vm9 = vcmask 257024   ;;  %vm567_vm10 = vcmask 1044484  }
  0x11   :  { %2238 = vmatprep.subr.mxu0 %v58_v3  ;;  %2249 = vmatpush3.msra.mxu1 %v2594_v4  ;;  %v172_v10 = vld [vmem:[%s3323_s1] sm:$0xf]  ;;  %vm167_vm3 = vcmp.ge.s32.totalorder %v166_v13, 64  ;;  %vm168_vm4 = vcmp.lt.s32.totalorder %v166_v13, 96  ;;  %vm772_vm11 = vcmask 1045509   ;;  %vm977_vm12 = vcmask 1046534  }
  0x12   :  { %2239 = vmatpush3.msra.mxu0 %v58_v3  ;;  %2240 = vmatprep.mubr.msk.f32.mxu0 %vm67_vm1, %v54_v5  ;;  %v2158_v15 = vld [vmem:[%s3327_s5] ss:$0 sm:$0xff]  ;;  %vm2658_vm5 = vmand %vm167_vm3, %vm168_vm4  ;;  %s2521_s5 = smov 64   ;;  %vm1183_vm13 = vcmask 1047559   ;;  %vm573_vm14 = vcmask 258049   ;;  %vm778_vm15 = vcmask 259074  }
  0x13   :  { %2250 = vmatprep.subr.mxu1 %v2518_v0  ;;  %2241 = vmatmul.mubr.msk.f32.vlgmr.msra.gmra.mxu0 %vm67_vm1, %v55_v6  ;;  %v2666_v20 = vsel %vm2658_vm5, 1.0, %v2520_v19  ;;  %v2684_v40 = vsel %vm2658_vm5, 0.0, %v2520_v19  ;;  %v173_v50 = vld [vmem:[%s3324_s2] sm:$0xf]  ;;  %vm1397_vm3 = vcmask 261125   ;;  %vm1399_vm4 = vcmask 253952  }
  0x14   :  { %2251 = vmatpush3.msra.mxu1 %v2607_v7  ;;  %2243 = vmatprep.mubr.msk.f32.mxu0 %vm67_vm1, %v56_v8  ;;  %v278_v53 = vrot.slane %v173_v50, 2  ;;  %v277_v54 = vrot.slane %v173_v50, 1  ;;  %v279_v55 = vrot.slane %v173_v50, 3  ;;  %vm1607_vm5 = vcmask 261126  }
  0x15   :  { %2252 = vmatprep.subr.mxu1 %v2518_v0  ;;  %2257 = vmatprep.subr.mxu0 %v2518_v0 }
  0x16   :  { %2253 = vmatpush3.msra.mxu1 %v2618_v9  ;;  %2258 = vmatpush3.msra.mxu0 %v2588_v2 }
  0x17   :  { %2255 = vmatmul.mubr.msk.f32.vlgmr.msra.gmra.mxu1 %vm174_vm2, %v172_v10  ;;  %2244 = vmatmul.mubr.msk.f32.gmra.mxu0 %vm67_vm1, %v57_v11  ;;  %vm1189_vm1 = vcmask 261124  }
  0x18   :  { %2259 = vmatprep.subr.mxu0 %v2518_v0  ;;  %2265 = vmatprep.mubr.msk.f32.mxu0 %vm2519_vm0, %v2518_v0 }
  0x19   :  { %2260 = vmatpush3.msra.mxu0 %v2594_v4  ;;  %2268 = vmatprep.subr.mxu1 %v2518_v0 }
  0x1a   :  { %2261 = vmatprep.subr.mxu0 %v2518_v0  ;;  %2269 = vmatpush3.msra.mxu1 %v2588_v2 }
  0x1b   :  { %2262 = vmatpush3.msra.mxu0 %v2607_v7  ;;  %2270 = vmatprep.subr.mxu1 %v2518_v0 }
  0x1c   :  { %2263 = vmatprep.subr.mxu0 %v2518_v0  ;;  %2271 = vmatpush3.msra.mxu1 %v2594_v4 }
  0x1d   :  { %2264 = vmatpush3.msra.mxu0 %v2618_v9  ;;  %2272 = vmatprep.subr.mxu1 %v2518_v0 }
  0x1e   :  { %2273 = vmatpush3.msra.mxu1 %v2607_v7  ;;  %2276 = vmatprep.mubr.msk.f32.mxu1 %vm2519_vm0, %v2518_v0 }
  0x1f   :  { %2274 = vmatprep.subr.mxu1 %v2518_v0  ;;  %2279 = vmatprep.subr.mxu0 %v2518_v0 }
  0x20   :  { %2275 = vmatpush3.msra.mxu1 %v2618_v9 }
  0x21   :  { %2290 = vmatprep.subr.mxu1 %v2518_v0 }
  0xd3   :  { %v2242_v14 = vpop.f32.mrf.mxu0 }
  0xd4   :  { %v2668_v23 = vadd.f32 %v2242_v14, %v2158_v15 }
  0xd5   :  { %v146_v17 = vpop.f32.mrf.mxu0 }
  0xd6   :  { %v2662_v18 = vadd.f32 %v2158_v15, %v146_v17 }
  0xd7   :  { %v244_v21 = vpop.f32.mrf.mxu1  ;;  %v2245_v22 = vpop.f32.mrf.mxu0 }
  0xd8   :  { %v249_v24 = vrot.slane %v244_v21, 1  ;;  %v251_v25 = vrot.slane %v244_v21, 3  ;;  %v256_v26 = vadd.f32 %v244_v21, %v2662_v18  ;;  %v2671_v27 = vadd.f32 %v2245_v22, %v2158_v15 }
  0xd9   :  { %v2256_v28 = vpop.f32.mrf.mxu1  ;;  %v156_v29 = vpop.f32.mrf.mxu0  ;;  %v250_v30 = vrot.slane %v244_v21, 2 }
  0xda   :  { %v257_v31 = vadd.f32 %v249_v24, %v2668_v23  ;;  %v260_v32 = vmul.f32 %v256_v26, %v2666_v20  ;;  %v2675_v33 = vadd.f32 %v2158_v15, %v156_v29  ;;  %v259_v34 = vadd.f32 %v251_v25, %v2671_v27 }
  0xdc   :  { %v261_v35 = vmul.f32 %v257_v31, %v2666_v20  ;;  %2361 = vtanh.f32 %v260_v32  ;;  %v258_v36 = vadd.f32 %v250_v30, %v2675_v33  ;;  %v263_v37 = vmul.f32 %v259_v34, %v2666_v20 }
  0xde   :  { %2363 = vtanh.f32 %v261_v35  ;;  %v262_v38 = vmul.f32 %v258_v36, %v2666_v20 }
  0xdf   :  { %2365 = vtanh.f32 %v263_v37 }
  0xe0   :  { %2367 = vtanh.f32 %v262_v38 }
  0xe9   :  { %v2362_v39 = vpop.eup %2361 }
  0xea   :  { %v268_v41 = vmul.f32 %v2362_v39, %v2666_v20 }
  0xeb   :  { %v2364_v42 = vpop.eup %2363 }
  0xec   :  { %v2366_v43 = vpop.eup %2365  ;;  %v2688_v44 = vadd.f32 %v268_v41, %v2684_v40  ;;  %v269_v45 = vmul.f32 %v2364_v42, %v2666_v20 }
  0xed   :  { %v2368_v46 = vpop.eup %2367  ;;  %v271_v47 = vmul.f32 %v2366_v43, %v2666_v20 }
  0xee   :  { %300 = vrot.lane.b32.xlu1 %v2688_v44, %s2521_s5  ;;  %v273_v48 = vadd.f32 %v269_v45, %v2684_v40  ;;  %v270_v49 = vmul.f32 %v2368_v46, %v2666_v20 }
  0xef   :  { %v275_v51 = vadd.f32 %v271_v47, %v2684_v40 }
  0xf0   :  { %302 = vrot.lane.b32.xlu0 %v273_v48, %s2521_s5  ;;  %v274_v52 = vadd.f32 %v270_v49, %v2684_v40 }
  0xf2   :  { %306 = vrot.lane.b32.xlu1 %v275_v51, %s2521_s5 }
  0xf4   :  { %304 = vrot.lane.b32.xlu0 %v274_v52, %s2521_s5 }
  0xf6   :  { %284 = vrot.lane.b32.xlu1 %v278_v53, %s2522_s19 }
  0xf8   :  { %282 = vrot.lane.b32.xlu0 %v277_v54, %s2522_s19 }
  0xfa   :  { %286 = vrot.lane.b32.xlu1 %v279_v55, %s2522_s19 }
  0xfc   :  { %280 = vrot.lane.b32.xlu0 %v173_v50, %s2522_s19 }
 0x160   :  { %v301_v56 = vpop.permute.xlu1 %300 }
 0x161   :  { %v312_v60 = vmul.f32 %v301_v56, %v2688_v44 }
 0x162   :  { %v303_v57 = vpop.permute.xlu0 %302 }
 0x163   :  { %v313_v58 = vmul.f32 %v303_v57, %v273_v48 }
 0x164   :  { %v307_v62 = vpop.permute.xlu1 %306 }
 0x165   :  { %322 = vrot.lane.b32.xlu0 %v313_v58, %s2522_s19  ;;  %v315_v63 = vmul.f32 %v307_v62, %v275_v51 }
 0x166   :  { %v305_v59 = vpop.permute.xlu0 %304 }
 0x167   :  { %v314_v61 = vmul.f32 %v305_v59, %v274_v52 }
 0x168   :  { %v285_v3 = vpop.permute.xlu1 %284 }
 0x169   :  { %320 = vrot.lane.b32.xlu0 %v312_v60, %s2522_s19  ;;  %324 = vrot.lane.b32.xlu1 %v314_v61, %s2522_s19  ;;  %v294_v13 = vmul.f32 %v285_v3, %v274_v52 }
 0x16a   :  { %v283_v1 = vpop.permute.xlu0 %282 }
 0x16b   :  { %v293_v6 = vmul.f32 %v283_v1, %v273_v48 }
 0x16c   :  { %v287_v8 = vpop.permute.xlu1 %286 }
 0x16d   :  { %326 = vrot.lane.b32.xlu1 %v315_v63, %s2522_s19  ;;  %v295_v21 = vmul.f32 %v287_v8, %v275_v51 }
 0x16e   :  { %v281_v5 = vpop.permute.xlu0 %280 }
 0x16f   :  { %v292_v14 = vmul.f32 %v281_v5, %v2688_v44 }
 0x1d7   :  { %v323_v10 = vpop.permute.xlu0 %322 }
 0x1d8   :  { %v2713_v11 = vadd.f32 %v323_v10, %v293_v6 }
 0x1da   :  { %2369 = vtanh.f32 %v2713_v11 }
 0x1db   :  { %v325_v15 = vpop.permute.xlu1 %324  ;;  %v321_v16 = vpop.permute.xlu0 %320 }
 0x1dc   :  { %v2717_v17 = vadd.f32 %v325_v15, %v294_v13  ;;  %v2719_v19 = vadd.f32 %v321_v16, %v292_v14 }
 0x1de   :  { %2371 = vtanh.f32 %v2717_v17 }
 0x1df   :  { %2373 = vtanh.f32 %v2719_v19  ;;  %v327_v22 = vpop.permute.xlu1 %326 }
 0x1e0   :  { %v2723_v24 = vadd.f32 %v327_v22, %v295_v21 }
 0x1e2   :  { %2375 = vtanh.f32 %v2723_v24 }
 0x1e7   :  { %v2370_v25 = vpop.eup %2369 }
 0x1e8   :  { %346 = vrot.lane.b32.xlu0 %v2370_v25, %s2521_s5 }
 0x1eb   :  { %v2372_v26 = vpop.eup %2371 }
 0x1ec   :  { %v2374_v28 = vpop.eup %2373  ;;  %348 = vrot.lane.b32.xlu1 %v2372_v26, %s2521_s5 }
 0x1ed   :  { %344 = vrot.lane.b32.xlu0 %v2374_v28, %s2521_s5 }
 0x1ef   :  { %v2376_v29 = vpop.eup %2375 }
 0x1f0   :  { %350 = vrot.lane.b32.xlu1 %v2376_v29, %s2521_s5 }
 0x25a   :  { %v347_v30 = vpop.permute.xlu0 %346 }
 0x25b   :  { %v357_v31 = vmul.f32 %v347_v30, %v273_v48  ;;  %v482_v30 = vrot.slane %v2719_v19, 7 }
 0x25d   :  { %v364_v37 = vrot.slane %v357_v31, 7  ;;  %v484_v31 = vrot.slane %v2717_v17, 7 }
 0x25e   :  { %v349_v32 = vpop.permute.xlu1 %348 }
 0x25f   :  { %v358_v34 = vmul.f32 %v349_v32, %v274_v52  ;;  %v345_v35 = vpop.permute.xlu0 %344 }
 0x260   :  { %v356_v36 = vmul.f32 %v345_v35, %v2688_v44 }
 0x261   :  { %v367_v38 = vrot.slane %v358_v34, 6 }
 0x262   :  { %v351_v39 = vpop.permute.xlu1 %350  ;;  %v366_v42 = vsel %vm365_vm6, %v364_v37, %v356_v36  ;;  %v483_v36 = vrot.slane %v2713_v11, 7 }
 0x263   :  { %v359_v41 = vmul.f32 %v351_v39, %v275_v51  ;;  %v369_v45 = vsel %vm368_vm7, %v367_v38, %v366_v42  ;;  %v485_v39 = vrot.slane %v2723_v24, 7 }
 0x265   :  { %v370_v43 = vrot.slane %v359_v41, 5 }
 0x267   :  { %v372_v46 = vsel %vm371_vm8, %v370_v43, %v369_v45 }
 0x268   :  { %373 = vrot.lane.b32.xlu0 %v372_v46, %s2522_s19 }
 0x2da   :  { %v374_v47 = vpop.permute.xlu0 %373 }
 0x2db   :  { %377 = vst.msk [vmem:[#allocation2] sm:$0xf] %vm376_vm9, %v374_v47  ;;  %2266 = vmatmul.mubr.msk.f32.vlgmr.msra.gmra.mxu0 %vm174_vm2, %v374_v47  ;;  %vm1609_vm9 = vcmask 254976  }
 0x2dc   :  { %2280 = vmatpush3.msra.mxu0 %v2588_v2  ;;  %2287 = vmatprep.mubr.msk.f32.mxu0 %vm2519_vm0, %v2518_v0 }
 0x2dd   :  { %2281 = vmatprep.subr.mxu0 %v2518_v0 }
 0x2de   :  { %2282 = vmatpush3.msra.mxu0 %v2594_v4 }
 0x2df   :  { %2283 = vmatprep.subr.mxu0 %v2518_v0 }
 0x2e0   :  { %2284 = vmatpush3.msra.mxu0 %v2607_v7 }
 0x2e1   :  { %2285 = vmatprep.subr.mxu0 %v2518_v0 }
 0x2e2   :  { %2286 = vmatpush3.msra.mxu0 %v2618_v9 }
 0x2e3   :  { %2301 = vmatprep.subr.mxu0 %v2518_v0 }
 0x39b   :  { %v446_v44 = vpop.f32.mrf.mxu0 }
 0x39c   :  { %v451_v48 = vrot.slane %v446_v44, 7  ;;  %v452_v49 = vrot.slane %v446_v44, 1  ;;  %v453_v50 = vrot.slane %v446_v44, 2  ;;  %v459_v51 = vadd.f32 %v446_v44, %v2668_v23 }
 0x39d   :  { %v2267_v52 = vpop.f32.mrf.mxu0 }
 0x39e   :  { %v458_v53 = vadd.f32 %v451_v48, %v2662_v18  ;;  %v460_v54 = vadd.f32 %v452_v49, %v2675_v33  ;;  %v461_v55 = vadd.f32 %v453_v50, %v2671_v27  ;;  %v463_v56 = vmul.f32 %v459_v51, %v2666_v20 }
 0x3a0   :  { %v462_v57 = vmul.f32 %v458_v53, %v2666_v20  ;;  %v464_v58 = vmul.f32 %v460_v54, %v2666_v20  ;;  %v465_v59 = vmul.f32 %v461_v55, %v2666_v20  ;;  %2377 = vtanh.f32 %v463_v56 }
 0x3a2   :  { %2379 = vtanh.f32 %v462_v57 }
 0x3a3   :  { %2381 = vtanh.f32 %v464_v58 }
 0x3a4   :  { %2383 = vtanh.f32 %v465_v59 }
 0x3ad   :  { %v2378_v60 = vpop.eup %2377 }
 0x3ae   :  { %v471_v6 = vmul.f32 %v2378_v60, %v2666_v20 }
 0x3af   :  { %v2380_v61 = vpop.eup %2379 }
 0x3b0   :  { %v2382_v62 = vpop.eup %2381  ;;  %v470_v63 = vmul.f32 %v2380_v61, %v2666_v20  ;;  %v475_v13 = vadd.f32 %v471_v6, %v2684_v40 }
 0x3b1   :  { %v2384_v1 = vpop.eup %2383  ;;  %v472_v3 = vmul.f32 %v2382_v62, %v2666_v20 }
 0x3b2   :  { %v474_v5 = vadd.f32 %v470_v63, %v2684_v40  ;;  %v473_v10 = vmul.f32 %v2384_v1, %v2666_v20  ;;  %v491_v42 = vmul.f32 %v483_v36, %v475_v13 }
 0x3b3   :  { %v476_v8 = vadd.f32 %v472_v3, %v2684_v40 }
 0x3b4   :  { %498 = vrot.lane.b32.xlu1 %v474_v5, %s2521_s5  ;;  %v477_v14 = vadd.f32 %v473_v10, %v2684_v40  ;;  %v490_v32 = vmul.f32 %v482_v30, %v474_v5 }
 0x3b5   :  { %502 = vrot.lane.b32.xlu0 %v476_v8, %s2521_s5  ;;  %v492_v34 = vmul.f32 %v484_v31, %v476_v8 }
 0x3b6   :  { %v493_v19 = vmul.f32 %v485_v39, %v477_v14 }
 0x3b8   :  { %500 = vrot.lane.b32.xlu1 %v475_v13, %s2521_s5 }
 0x3b9   :  { %504 = vrot.lane.b32.xlu0 %v477_v14, %s2521_s5 }
 0x426   :  { %v499_v15 = vpop.permute.xlu1 %498 }
 0x427   :  { %v503_v16 = vpop.permute.xlu0 %502  ;;  %v510_v21 = vmul.f32 %v499_v15, %v474_v5 }
 0x428   :  { %v512_v22 = vmul.f32 %v503_v16, %v476_v8 }
 0x429   :  { %518 = vrot.lane.b32.xlu1 %v510_v21, %s2522_s19 }
 0x42a   :  { %522 = vrot.lane.b32.xlu0 %v512_v22, %s2522_s19  ;;  %v501_v25 = vpop.permute.xlu1 %500 }
 0x42b   :  { %v505_v26 = vpop.permute.xlu0 %504  ;;  %v511_v28 = vmul.f32 %v501_v25, %v475_v13 }
 0x42c   :  { %v513_v29 = vmul.f32 %v505_v26, %v477_v14 }
 0x42d   :  { %520 = vrot.lane.b32.xlu1 %v511_v28, %s2522_s19 }
 0x42e   :  { %524 = vrot.lane.b32.xlu0 %v513_v29, %s2522_s19 }
 0x49b   :  { %v519_v35 = vpop.permute.xlu1 %518 }
 0x49c   :  { %v523_v37 = vpop.permute.xlu0 %522  ;;  %v2773_v38 = vadd.f32 %v519_v35, %v490_v32 }
 0x49d   :  { %v2776_v41 = vadd.f32 %v523_v37, %v492_v34 }
 0x49e   :  { %2385 = vtanh.f32 %v2773_v38 }
 0x49f   :  { %2387 = vtanh.f32 %v2776_v41  ;;  %v521_v43 = vpop.permute.xlu1 %520 }
 0x4a0   :  { %v525_v17 = vpop.permute.xlu0 %524  ;;  %v2780_v45 = vadd.f32 %v521_v43, %v491_v42 }
 0x4a1   :  { %v2782_v46 = vadd.f32 %v525_v17, %v493_v19 }
 0x4a2   :  { %2389 = vtanh.f32 %v2780_v45 }
 0x4a3   :  { %2391 = vtanh.f32 %v2782_v46 }
 0x4ab   :  { %v2386_v11 = vpop.eup %2385 }
 0x4ac   :  { %v2388_v24 = vpop.eup %2387  ;;  %542 = vrot.lane.b32.xlu1 %v2386_v11, %s2521_s5 }
 0x4ad   :  { %546 = vrot.lane.b32.xlu0 %v2388_v24, %s2521_s5 }
 0x4af   :  { %v2390_v47 = vpop.eup %2389 }
 0x4b0   :  { %v2392_v44 = vpop.eup %2391  ;;  %544 = vrot.lane.b32.xlu1 %v2390_v47, %s2521_s5 }
 0x4b1   :  { %548 = vrot.lane.b32.xlu0 %v2392_v44, %s2521_s5 }
 0x51e   :  { %v543_v48 = vpop.permute.xlu1 %542 }
 0x51f   :  { %v547_v49 = vpop.permute.xlu0 %546  ;;  %v554_v50 = vmul.f32 %v543_v48, %v474_v5 }
 0x520   :  { %v556_v51 = vmul.f32 %v547_v49, %v476_v8 }
 0x521   :  { %v575_v53 = vrot.slane %v554_v50, 1 }
 0x522   :  { %v545_v52 = vpop.permute.xlu1 %544  ;;  %v577_v56 = vrot.slane %v556_v51, 7  ;;  %v564_v60 = vrot.slane %v556_v51, 6 }
 0x523   :  { %v549_v54 = vpop.permute.xlu0 %548  ;;  %v555_v55 = vmul.f32 %v545_v52, %v475_v13 }
 0x524   :  { %v557_v57 = vmul.f32 %v549_v54, %v477_v14  ;;  %v687_v54 = vrot.slane %v2773_v38, 7 }
 0x525   :  { %v562_v58 = vrot.slane %v555_v55, 7  ;;  %v576_v59 = vsel %vm365_vm6, %v555_v55, %v575_v53  ;;  %v688_v55 = vrot.slane %v2780_v45, 7 }
 0x526   :  { %v579_v61 = vrot.slane %v557_v57, 6  ;;  %v578_v62 = vsel %vm368_vm7, %v577_v56, %v576_v59  ;;  %v566_v63 = vrot.slane %v557_v57, 5  ;;  %v690_v59 = vrot.slane %v2782_v46, 7 }
 0x527   :  { %v563_v1 = vsel %vm368_vm7, %v562_v58, %v554_v50 }
 0x528   :  { %v580_v3 = vsel %vm371_vm8, %v579_v61, %v578_v62  ;;  %v565_v5 = vsel %vm371_vm8, %v564_v60, %v563_v1  ;;  %v689_v62 = vrot.slane %v2776_v41, 7 }
 0x529   :  { %581 = vrot.lane.b32.xlu1 %v580_v3, %s2522_s19  ;;  %v2797_v6 = vsel %vm567_vm10, %v566_v63, %v565_v5 }
 0x59b   :  { %v582_v8 = vpop.permute.xlu1 %581 }
 0x59c   :  { %2277 = vmatmul.mubr.msk.f32.vlgmr.msra.gmra.mxu1 %vm174_vm2, %v582_v8 }
 0x59d   :  { %2291 = vmatpush3.msra.mxu1 %v2588_v2  ;;  %2298 = vmatprep.mubr.msk.f32.mxu1 %vm2519_vm0, %v2518_v0 }
 0x59e   :  { %2292 = vmatprep.subr.mxu1 %v2518_v0 }
 0x59f   :  { %2293 = vmatpush3.msra.mxu1 %v2594_v4 }
 0x5a0   :  { %2294 = vmatprep.subr.mxu1 %v2518_v0 }
 0x5a1   :  { %2295 = vmatpush3.msra.mxu1 %v2607_v7 }
 0x5a2   :  { %2296 = vmatprep.subr.mxu1 %v2518_v0 }
 0x5a3   :  { %2297 = vmatpush3.msra.mxu1 %v2618_v9 }
 0x5a4   :  { %2312 = vmatprep.subr.mxu1 %v2518_v0 }
 0x65c   :  { %v651_v10 = vpop.f32.mrf.mxu1 }
 0x65d   :  { %v656_v13 = vrot.slane %v651_v10, 6  ;;  %v657_v14 = vrot.slane %v651_v10, 7  ;;  %v658_v15 = vrot.slane %v651_v10, 1  ;;  %v665_v16 = vadd.f32 %v651_v10, %v2675_v33 }
 0x65e   :  { %v2278_v21 = vpop.f32.mrf.mxu1 }
 0x65f   :  { %v663_v22 = vadd.f32 %v656_v13, %v2662_v18  ;;  %v664_v25 = vadd.f32 %v657_v14, %v2668_v23  ;;  %v666_v26 = vadd.f32 %v658_v15, %v2671_v27  ;;  %v669_v28 = vmul.f32 %v665_v16, %v2666_v20 }
 0x661   :  { %v667_v29 = vmul.f32 %v663_v22, %v2666_v20  ;;  %v668_v30 = vmul.f32 %v664_v25, %v2666_v20  ;;  %v670_v31 = vmul.f32 %v666_v26, %v2666_v20  ;;  %2393 = vtanh.f32 %v669_v28 }
 0x663   :  { %2395 = vtanh.f32 %v667_v29 }
 0x664   :  { %2397 = vtanh.f32 %v668_v30 }
 0x665   :  { %2399 = vtanh.f32 %v670_v31 }
 0x66e   :  { %v2394_v32 = vpop.eup %2393 }
 0x66f   :  { %v677_v17 = vmul.f32 %v2394_v32, %v2666_v20 }
 0x670   :  { %v2396_v34 = vpop.eup %2395 }
 0x671   :  { %v2398_v35 = vpop.eup %2397  ;;  %v675_v36 = vmul.f32 %v2396_v34, %v2666_v20  ;;  %v681_v24 = vadd.f32 %v677_v17, %v2684_v40 }
 0x672   :  { %v2400_v37 = vpop.eup %2399  ;;  %v676_v39 = vmul.f32 %v2398_v35, %v2666_v20 }
 0x673   :  { %v679_v42 = vadd.f32 %v675_v36, %v2684_v40  ;;  %v678_v19 = vmul.f32 %v2400_v37, %v2666_v20  ;;  %v697_v38 = vmul.f32 %v689_v62, %v681_v24 }
 0x674   :  { %v680_v43 = vadd.f32 %v676_v39, %v2684_v40 }
 0x675   :  { %703 = vrot.lane.b32.xlu0 %v679_v42, %s2521_s5  ;;  %v682_v11 = vadd.f32 %v678_v19, %v2684_v40  ;;  %v695_v56 = vmul.f32 %v687_v54, %v679_v42 }
 0x676   :  { %705 = vrot.lane.b32.xlu1 %v680_v43, %s2521_s5  ;;  %v696_v57 = vmul.f32 %v688_v55, %v680_v43 }
 0x677   :  { %v698_v1 = vmul.f32 %v690_v59, %v682_v11 }
 0x679   :  { %709 = vrot.lane.b32.xlu0 %v682_v11, %s2521_s5 }
 0x67a   :  { %707 = vrot.lane.b32.xlu1 %v681_v24, %s2521_s5 }
 0x6e7   :  { %v704_v47 = vpop.permute.xlu0 %703 }
 0x6e8   :  { %v706_v44 = vpop.permute.xlu1 %705  ;;  %v715_v48 = vmul.f32 %v704_v47, %v679_v42 }
 0x6e9   :  { %v716_v49 = vmul.f32 %v706_v44, %v680_v43 }
 0x6ea   :  { %723 = vrot.lane.b32.xlu0 %v715_v48, %s2522_s19 }
 0x6eb   :  { %725 = vrot.lane.b32.xlu1 %v716_v49, %s2522_s19  ;;  %v710_v50 = vpop.permute.xlu0 %709 }
 0x6ec   :  { %v708_v51 = vpop.permute.xlu1 %707  ;;  %v718_v52 = vmul.f32 %v710_v50, %v682_v11 }
 0x6ed   :  { %v717_v53 = vmul.f32 %v708_v51, %v681_v24 }
 0x6ee   :  { %729 = vrot.lane.b32.xlu0 %v718_v52, %s2522_s19 }
 0x6ef   :  { %727 = vrot.lane.b32.xlu1 %v717_v53, %s2522_s19 }
 0x75c   :  { %v724_v58 = vpop.permute.xlu0 %723 }
 0x75d   :  { %v726_v60 = vpop.permute.xlu1 %725  ;;  %v2837_v61 = vadd.f32 %v724_v58, %v695_v56 }
 0x75e   :  { %v2840_v63 = vadd.f32 %v726_v60, %v696_v57 }
 0x75f   :  { %2401 = vtanh.f32 %v2837_v61 }
 0x760   :  { %2403 = vtanh.f32 %v2840_v63  ;;  %v730_v3 = vpop.permute.xlu0 %729 }
 0x761   :  { %v728_v45 = vpop.permute.xlu1 %727  ;;  %v2844_v5 = vadd.f32 %v730_v3, %v698_v1 }
 0x762   :  { %v2846_v8 = vadd.f32 %v728_v45, %v697_v38 }
 0x763   :  { %2405 = vtanh.f32 %v2844_v5 }
 0x764   :  { %2407 = vtanh.f32 %v2846_v8 }
 0x76c   :  { %v2402_v46 = vpop.eup %2401 }
 0x76d   :  { %v2404_v41 = vpop.eup %2403  ;;  %747 = vrot.lane.b32.xlu0 %v2402_v46, %s2521_s5 }
 0x76e   :  { %749 = vrot.lane.b32.xlu1 %v2404_v41, %s2521_s5 }
 0x770   :  { %v2406_v10 = vpop.eup %2405 }
 0x771   :  { %v2408_v13 = vpop.eup %2407  ;;  %753 = vrot.lane.b32.xlu0 %v2406_v10, %s2521_s5 }
 0x772   :  { %751 = vrot.lane.b32.xlu1 %v2408_v13, %s2521_s5 }
 0x7df   :  { %v748_v14 = vpop.permute.xlu0 %747 }
 0x7e0   :  { %v750_v15 = vpop.permute.xlu1 %749  ;;  %v759_v16 = vmul.f32 %v748_v14, %v679_v42 }
 0x7e1   :  { %v760_v21 = vmul.f32 %v750_v15, %v680_v43 }
 0x7e2   :  { %v780_v22 = vrot.slane %v759_v16, 2 }
 0x7e3   :  { %v767_v25 = vrot.slane %v760_v21, 7  ;;  %v781_v26 = vrot.slane %v760_v21, 1  ;;  %v754_v28 = vpop.permute.xlu0 %753 }
 0x7e4   :  { %v752_v29 = vpop.permute.xlu1 %751  ;;  %v762_v30 = vmul.f32 %v754_v28, %v682_v11  ;;  %v892_v28 = vrot.slane %v2837_v61, 7 }
 0x7e5   :  { %v768_v31 = vsel %vm371_vm8, %v767_v25, %v759_v16  ;;  %v761_v32 = vmul.f32 %v752_v29, %v681_v24  ;;  %v782_v34 = vsel %vm365_vm6, %v781_v26, %v780_v22  ;;  %v893_v29 = vrot.slane %v2840_v63, 7 }
 0x7e6   :  { %v771_v35 = vrot.slane %v762_v30, 5  ;;  %v784_v36 = vrot.slane %v762_v30, 7 }
 0x7e7   :  { %v769_v37 = vrot.slane %v761_v32, 6  ;;  %v783_v39 = vsel %vm368_vm7, %v761_v32, %v782_v34  ;;  %v894_v34 = vrot.slane %v2846_v8, 7 }
 0x7e8   :  { %v785_v42 = vsel %vm371_vm8, %v784_v36, %v783_v39 }
 0x7e9   :  { %786 = vrot.lane.b32.xlu0 %v785_v42, %s2522_s19  ;;  %v770_v19 = vsel %vm567_vm10, %v769_v37, %v768_v31  ;;  %v895_v37 = vrot.slane %v2844_v5, 7 }
 0x7ea   :  { %v2861_v43 = vsel %vm772_vm11, %v771_v35, %v770_v19 }
 0x85b   :  { %v787_v17 = vpop.permute.xlu0 %786 }
 0x85c   :  { %2288 = vmatmul.mubr.msk.f32.vlgmr.msra.gmra.mxu0 %vm174_vm2, %v787_v17 }
 0x85d   :  { %2302 = vmatpush3.msra.mxu0 %v2588_v2  ;;  %2309 = vmatprep.mubr.msk.f32.mxu0 %vm2519_vm0, %v2518_v0 }
 0x85e   :  { %2303 = vmatprep.subr.mxu0 %v2518_v0 }
 0x85f   :  { %2304 = vmatpush3.msra.mxu0 %v2594_v4 }
 0x860   :  { %2305 = vmatprep.subr.mxu0 %v2518_v0 }
 0x861   :  { %2306 = vmatpush3.msra.mxu0 %v2607_v7 }
 0x862   :  { %2307 = vmatprep.subr.mxu0 %v2518_v0 }
 0x863   :  { %2308 = vmatpush3.msra.mxu0 %v2618_v9 }
 0x864   :  { %2323 = vmatprep.subr.mxu0 %v2518_v0 }
 0x91c   :  { %v856_v11 = vpop.f32.mrf.mxu0 }
 0x91d   :  { %v861_v24 = vrot.slane %v856_v11, 5  ;;  %v862_v47 = vrot.slane %v856_v11, 6  ;;  %v863_v44 = vrot.slane %v856_v11, 7  ;;  %v871_v48 = vadd.f32 %v856_v11, %v2671_v27 }
 0x91e   :  { %v2289_v49 = vpop.f32.mrf.mxu0 }
 0x91f   :  { %v868_v50 = vadd.f32 %v861_v24, %v2662_v18  ;;  %v869_v51 = vadd.f32 %v862_v47, %v2668_v23  ;;  %v870_v52 = vadd.f32 %v863_v44, %v2675_v33  ;;  %v875_v53 = vmul.f32 %v871_v48, %v2666_v20 }
 0x921   :  { %v872_v54 = vmul.f32 %v868_v50, %v2666_v20  ;;  %v873_v55 = vmul.f32 %v869_v51, %v2666_v20  ;;  %v874_v56 = vmul.f32 %v870_v52, %v2666_v20  ;;  %2409 = vtanh.f32 %v875_v53 }
 0x923   :  { %2411 = vtanh.f32 %v872_v54 }
 0x924   :  { %2413 = vtanh.f32 %v873_v55 }
 0x925   :  { %2415 = vtanh.f32 %v874_v56 }
 0x92e   :  { %v2410_v57 = vpop.eup %2409 }
 0x92f   :  { %v883_v46 = vmul.f32 %v2410_v57, %v2666_v20 }
 0x930   :  { %v2412_v58 = vpop.eup %2411 }
 0x931   :  { %v2414_v59 = vpop.eup %2413  ;;  %v880_v60 = vmul.f32 %v2412_v58, %v2666_v20  ;;  %v887_v10 = vadd.f32 %v883_v46, %v2684_v40 }
 0x932   :  { %v2416_v62 = vpop.eup %2415  ;;  %v881_v1 = vmul.f32 %v2414_v59, %v2666_v20 }
 0x933   :  { %v884_v38 = vadd.f32 %v880_v60, %v2684_v40  ;;  %v882_v3 = vmul.f32 %v2416_v62, %v2666_v20  ;;  %v903_v61 = vmul.f32 %v895_v37, %v887_v10 }
 0x934   :  { %v885_v45 = vadd.f32 %v881_v1, %v2684_v40 }
 0x935   :  { %908 = vrot.lane.b32.xlu1 %v884_v38, %s2521_s5  ;;  %v886_v41 = vadd.f32 %v882_v3, %v2684_v40  ;;  %v900_v30 = vmul.f32 %v892_v28, %v884_v38 }
 0x936   :  { %910 = vrot.lane.b32.xlu0 %v885_v45, %s2521_s5  ;;  %v901_v31 = vmul.f32 %v893_v29, %v885_v45 }
 0x937   :  { %v902_v42 = vmul.f32 %v894_v34, %v886_v41 }
 0x939   :  { %912 = vrot.lane.b32.xlu1 %v886_v41, %s2521_s5 }
 0x93a   :  { %914 = vrot.lane.b32.xlu0 %v887_v10, %s2521_s5 }
 0x9a7   :  { %v909_v13 = vpop.permute.xlu1 %908 }
 0x9a8   :  { %v911_v14 = vpop.permute.xlu0 %910  ;;  %v920_v15 = vmul.f32 %v909_v13, %v884_v38 }
 0x9a9   :  { %v921_v16 = vmul.f32 %v911_v14, %v885_v45 }
 0x9aa   :  { %928 = vrot.lane.b32.xlu1 %v920_v15, %s2522_s19 }
 0x9ab   :  { %930 = vrot.lane.b32.xlu0 %v921_v16, %s2522_s19  ;;  %v913_v21 = vpop.permute.xlu1 %912 }
 0x9ac   :  { %v915_v22 = vpop.permute.xlu0 %914  ;;  %v922_v25 = vmul.f32 %v913_v21, %v886_v41 }
 0x9ad   :  { %v923_v26 = vmul.f32 %v915_v22, %v887_v10 }
 0x9ae   :  { %932 = vrot.lane.b32.xlu1 %v922_v25, %s2522_s19 }
 0x9af   :  { %934 = vrot.lane.b32.xlu0 %v923_v26, %s2522_s19 }
 0xa1c   :  { %v929_v32 = vpop.permute.xlu1 %928 }
 0xa1d   :  { %v931_v35 = vpop.permute.xlu0 %930  ;;  %v2901_v36 = vadd.f32 %v929_v32, %v900_v30 }
 0xa1e   :  { %v2904_v39 = vadd.f32 %v931_v35, %v901_v31 }
 0xa1f   :  { %2417 = vtanh.f32 %v2901_v36 }
 0xa20   :  { %2419 = vtanh.f32 %v2904_v39  ;;  %v933_v19 = vpop.permute.xlu1 %932 }
 0xa21   :  { %v935_v63 = vpop.permute.xlu0 %934  ;;  %v2908_v17 = vadd.f32 %v933_v19, %v902_v42 }
 0xa22   :  { %v2910_v11 = vadd.f32 %v935_v63, %v903_v61 }
 0xa23   :  { %2421 = vtanh.f32 %v2908_v17 }
 0xa24   :  { %2423 = vtanh.f32 %v2910_v11 }
 0xa2c   :  { %v2418_v8 = vpop.eup %2417 }
 0xa2d   :  { %v2420_v5 = vpop.eup %2419  ;;  %952 = vrot.lane.b32.xlu1 %v2418_v8, %s2521_s5 }
 0xa2e   :  { %954 = vrot.lane.b32.xlu0 %v2420_v5, %s2521_s5 }
 0xa30   :  { %v2422_v24 = vpop.eup %2421 }
 0xa31   :  { %v2424_v47 = vpop.eup %2423  ;;  %956 = vrot.lane.b32.xlu1 %v2422_v24, %s2521_s5 }
 0xa32   :  { %958 = vrot.lane.b32.xlu0 %v2424_v47, %s2521_s5 }
 0xa9f   :  { %v953_v44 = vpop.permute.xlu1 %952 }
 0xaa0   :  { %v955_v48 = vpop.permute.xlu0 %954  ;;  %v964_v49 = vmul.f32 %v953_v44, %v884_v38 }
 0xaa1   :  { %v965_v50 = vmul.f32 %v955_v48, %v885_v45 }
 0xaa2   :  { %v985_v53 = vrot.slane %v964_v49, 3 }
 0xaa3   :  { %v972_v51 = vrot.slane %v965_v50, 7  ;;  %v986_v52 = vrot.slane %v965_v50, 2  ;;  %v957_v54 = vpop.permute.xlu1 %956 }
 0xaa4   :  { %v959_v55 = vpop.permute.xlu0 %958  ;;  %v966_v56 = vmul.f32 %v957_v54, %v886_v41 }
 0xaa5   :  { %v973_v57 = vsel %vm567_vm10, %v972_v51, %v964_v49  ;;  %v967_v58 = vmul.f32 %v959_v55, %v887_v10  ;;  %v987_v1 = vsel %vm365_vm6, %v986_v52, %v985_v53  ;;  %v1098_v52 = vrot.slane %v2901_v36, 7 }
 0xaa6   :  { %v974_v59 = vrot.slane %v966_v56, 6  ;;  %v988_v60 = vrot.slane %v966_v56, 1  ;;  %v1099_v53 = vrot.slane %v2904_v39, 7 }
 0xaa7   :  { %v976_v62 = vrot.slane %v967_v58, 5 }
 0xaa8   :  { %v989_v3 = vsel %vm368_vm7, %v988_v60, %v987_v1  ;;  %v975_v38 = vsel %vm772_vm11, %v974_v59, %v973_v57  ;;  %v1100_v57 = vrot.slane %v2908_v17, 7  ;;  %v1101_v60 = vrot.slane %v2910_v11, 7 }
 0xaa9   :  { %v990_v45 = vsel %vm371_vm8, %v967_v58, %v989_v3  ;;  %v2924_v46 = vsel %vm977_vm12, %v976_v62, %v975_v38 }
 0xaaa   :  { %991 = vrot.lane.b32.xlu1 %v990_v45, %s2522_s19 }
 0xb1c   :  { %v992_v41 = vpop.permute.xlu1 %991 }
 0xb1d   :  { %2299 = vmatmul.mubr.msk.f32.vlgmr.msra.gmra.mxu1 %vm174_vm2, %v992_v41 }
 0xb1e   :  { %2313 = vmatpush3.msra.mxu1 %v2588_v2  ;;  %2320 = vmatprep.mubr.msk.f32.mxu1 %vm2519_vm0, %v2518_v0 }
 0xb1f   :  { %2314 = vmatprep.subr.mxu1 %v2518_v0 }
 0xb20   :  { %2315 = vmatpush3.msra.mxu1 %v2594_v4 }
 0xb21   :  { %2316 = vmatprep.subr.mxu1 %v2518_v0 }
 0xb22   :  { %2317 = vmatpush3.msra.mxu1 %v2607_v7 }
 0xb23   :  { %2318 = vmatprep.subr.mxu1 %v2518_v0 }
 0xb24   :  { %2319 = vmatpush3.msra.mxu1 %v2618_v9 }
 0xbdd   :  { %v1061_v10 = vpop.f32.mrf.mxu1 }
 0xbde   :  { %v1066_v13 = vrot.slane %v1061_v10, 4  ;;  %v1067_v14 = vrot.slane %v1061_v10, 5  ;;  %v1068_v15 = vrot.slane %v1061_v10, 6  ;;  %v1069_v2 = vrot.slane %v1061_v10, 7 }
 0xbdf   :  { %v2300_v16 = vpop.f32.mrf.mxu1 }
 0xbe0   :  { %v1074_v21 = vadd.f32 %v1066_v13, %v2662_v18  ;;  %v1075_v22 = vadd.f32 %v1067_v14, %v2668_v23  ;;  %v1076_v4 = vadd.f32 %v1068_v15, %v2675_v33  ;;  %v1077_v25 = vadd.f32 %v1069_v2, %v2671_v27 }
 0xbe2   :  { %v1078_v7 = vmul.f32 %v1074_v21, %v2666_v20  ;;  %v1079_v26 = vmul.f32 %v1075_v22, %v2666_v20  ;;  %v1080_v9 = vmul.f32 %v1076_v4, %v2666_v20  ;;  %v1081_v28 = vmul.f32 %v1077_v25, %v2666_v20 }
 0xbe4   :  { %2425 = vtanh.f32 %v1078_v7 }
 0xbe5   :  { %2427 = vtanh.f32 %v1079_v26 }
 0xbe6   :  { %2429 = vtanh.f32 %v1080_v9 }
 0xbe7   :  { %2431 = vtanh.f32 %v1081_v28 }
 0xbf1   :  { %v2426_v29 = vpop.eup %2425 }
 0xbf2   :  { %v2428_v30 = vpop.eup %2427  ;;  %v1086_v31 = vmul.f32 %v2426_v29, %v2666_v20 }
 0xbf3   :  { %v2430_v32 = vpop.eup %2429  ;;  %v1087_v34 = vmul.f32 %v2428_v30, %v2666_v20 }
 0xbf4   :  { %v2432_v35 = vpop.eup %2431  ;;  %v1090_v37 = vadd.f32 %v1086_v31, %v2684_v40  ;;  %v1088_v42 = vmul.f32 %v2430_v32, %v2666_v20 }
 0xbf5   :  { %v1091_v61 = vadd.f32 %v1087_v34, %v2684_v40  ;;  %v1089_v19 = vmul.f32 %v2432_v35, %v2666_v20 }
 0xbf6   :  { %1114 = vrot.lane.b32.xlu0 %v1090_v37, %s2521_s5  ;;  %v1092_v63 = vadd.f32 %v1088_v42, %v2684_v40  ;;  %v1106_v54 = vmul.f32 %v1098_v52, %v1090_v37 }
 0xbf7   :  { %1116 = vrot.lane.b32.xlu1 %v1091_v61, %s2521_s5  ;;  %v1093_v8 = vadd.f32 %v1089_v19, %v2684_v40  ;;  %v1107_v55 = vmul.f32 %v1099_v53, %v1091_v61  ;;  %v2489_v19 = vld [vmem:[%s3326_s4 + $0x18] sm:$0xff] }
 0xbf8   :  { %v1108_v1 = vmul.f32 %v1100_v57, %v1092_v63 }
 0xbf9   :  { %v1109_v36 = vmul.f32 %v1101_v60, %v1093_v8 }
 0xbfa   :  { %1118 = vrot.lane.b32.xlu0 %v1092_v63, %s2521_s5 }
 0xbfb   :  { %1120 = vrot.lane.b32.xlu1 %v1093_v8, %s2521_s5 }
 0xc68   :  { %v1115_v5 = vpop.permute.xlu0 %1114 }
 0xc69   :  { %v1117_v24 = vpop.permute.xlu1 %1116  ;;  %v1126_v47 = vmul.f32 %v1115_v5, %v1090_v37  ;;  %v2492_v5 = vld [vmem:[%s3326_s4] sm:$0xff] }
 0xc6a   :  { %v1127_v44 = vmul.f32 %v1117_v24, %v1091_v61 }
 0xc6b   :  { %1134 = vrot.lane.b32.xlu0 %v1126_v47, %s2522_s19 }
 0xc6c   :  { %1136 = vrot.lane.b32.xlu1 %v1127_v44, %s2522_s19  ;;  %v1119_v48 = vpop.permute.xlu0 %1118 }
 0xc6d   :  { %v1121_v49 = vpop.permute.xlu1 %1120  ;;  %v1128_v50 = vmul.f32 %v1119_v48, %v1092_v63 }
 0xc6e   :  { %v1129_v51 = vmul.f32 %v1121_v49, %v1093_v8 }
 0xc6f   :  { %1138 = vrot.lane.b32.xlu0 %v1128_v50, %s2522_s19 }
 0xc70   :  { %1140 = vrot.lane.b32.xlu1 %v1129_v51, %s2522_s19 }
 0xcdd   :  { %v1135_v56 = vpop.permute.xlu0 %1134 }
 0xcde   :  { %v1137_v58 = vpop.permute.xlu1 %1136  ;;  %v2964_v59 = vadd.f32 %v1135_v56, %v1106_v54 }
 0xcdf   :  { %v2967_v62 = vadd.f32 %v1137_v58, %v1107_v55 }
 0xce0   :  { %2433 = vtanh.f32 %v2964_v59 }
 0xce1   :  { %2435 = vtanh.f32 %v2967_v62  ;;  %v1139_v3 = vpop.permute.xlu0 %1138 }
 0xce2   :  { %v1141_v39 = vpop.permute.xlu1 %1140  ;;  %v2971_v38 = vadd.f32 %v1139_v3, %v1108_v1 }
 0xce3   :  { %v2973_v45 = vadd.f32 %v1141_v39, %v1109_v36 }
 0xce4   :  { %2437 = vtanh.f32 %v2971_v38 }
 0xce5   :  { %2439 = vtanh.f32 %v2973_v45 }
 0xced   :  { %v2434_v17 = vpop.eup %2433 }
 0xcee   :  { %v2436_v11 = vpop.eup %2435  ;;  %1158 = vrot.lane.b32.xlu0 %v2434_v17, %s2521_s5 }
 0xcef   :  { %1160 = vrot.lane.b32.xlu1 %v2436_v11, %s2521_s5 }
 0xcf1   :  { %v2438_v41 = vpop.eup %2437 }
 0xcf2   :  { %v2440_v10 = vpop.eup %2439  ;;  %1162 = vrot.lane.b32.xlu0 %v2438_v41, %s2521_s5 }
 0xcf3   :  { %1164 = vrot.lane.b32.xlu1 %v2440_v10, %s2521_s5 }
 0xd60   :  { %v1159_v13 = vpop.permute.xlu0 %1158 }
 0xd61   :  { %v1161_v14 = vpop.permute.xlu1 %1160  ;;  %v1170_v15 = vmul.f32 %v1159_v13, %v1090_v37 }
 0xd62   :  { %v1171_v2 = vmul.f32 %v1161_v14, %v1091_v61 }
 0xd63   :  { %v1191_v22 = vrot.slane %v1170_v15, 4 }
 0xd64   :  { %v1178_v16 = vrot.slane %v1171_v2, 7  ;;  %v1192_v21 = vrot.slane %v1171_v2, 3  ;;  %v1163_v4 = vpop.permute.xlu0 %1162 }
 0xd65   :  { %v1165_v25 = vpop.permute.xlu1 %1164  ;;  %v1172_v7 = vmul.f32 %v1163_v4, %v1092_v63  ;;  %v2490_v63 = vld [vmem:[%s3326_s4 + $0x10] sm:$0xff] }
 0xd66   :  { %v1179_v26 = vsel %vm772_vm11, %v1178_v16, %v1170_v15  ;;  %v1173_v9 = vmul.f32 %v1165_v25, %v1093_v8  ;;  %v1193_v32 = vsel %vm365_vm6, %v1192_v21, %v1191_v22  ;;  %v2491_v8 = vld [vmem:[%s3326_s4 + $0x8] sm:$0xff] }
 0xd67   :  { %v1180_v28 = vrot.slane %v1172_v7, 6  ;;  %v1194_v29 = vrot.slane %v1172_v7, 2 }
 0xd68   :  { %v1182_v30 = vrot.slane %v1173_v9, 5  ;;  %v1196_v31 = vrot.slane %v1173_v9, 1  ;;  %v1306_v9 = vrot.slane %v2967_v62, 7 }
 0xd69   :  { %v1195_v34 = vsel %vm368_vm7, %v1194_v29, %v1193_v32  ;;  %v1181_v35 = vsel %vm977_vm12, %v1180_v28, %v1179_v26  ;;  %v1305_v26 = vrot.slane %v2964_v59, 7 }
 0xd6a   :  { %v1197_v37 = vsel %vm371_vm8, %v1196_v31, %v1195_v34  ;;  %v2987_v42 = vsel %vm1183_vm13, %v1182_v30, %v1181_v35  ;;  %v1307_v31 = vrot.slane %v2971_v38, 7  ;;  %v1308_v35 = vrot.slane %v2973_v45, 7 }
 0xd6b   :  { %1198 = vrot.lane.b32.xlu0 %v1197_v37, %s2522_s19 }
 0xddd   :  { %v1199_v61 = vpop.permute.xlu0 %1198 }
 0xdde   :  { %2310 = vmatmul.mubr.msk.f32.vlgmr.msra.gmra.mxu0 %vm174_vm2, %v1199_v61 }
 0xddf   :  { %2324 = vmatpush3.msra.mxu0 %v2489_v19  ;;  %2331 = vmatprep.mubr.msk.f32.mxu0 %vm2519_vm0, %v2518_v0  ;;  %vm983_vm0 = vcmask 260099  }
 0xde0   :  { %2325 = vmatprep.subr.mxu0 %v2518_v0 }
 0xde1   :  { %2326 = vmatpush3.msra.mxu0 %v2490_v63 }
 0xde2   :  { %2327 = vmatprep.subr.mxu0 %v2518_v0 }
 0xde3   :  { %2328 = vmatpush3.msra.mxu0 %v2491_v8 }
 0xde4   :  { %2329 = vmatprep.subr.mxu0 %v2518_v0 }
 0xde5   :  { %2330 = vmatpush3.msra.mxu0 %v2492_v5 }
 0xe9e   :  { %v1268_v24 = vpop.f32.mrf.mxu0 }
 0xe9f   :  { %v1273_v47 = vrot.slane %v1268_v24, 3  ;;  %v1274_v44 = vrot.slane %v1268_v24, 4  ;;  %v1275_v48 = vrot.slane %v1268_v24, 5  ;;  %v1276_v49 = vrot.slane %v1268_v24, 6 }
 0xea0   :  { %v2311_v50 = vpop.f32.mrf.mxu0 }
 0xea1   :  { %v1281_v51 = vadd.f32 %v1273_v47, %v2662_v18  ;;  %v1282_v52 = vadd.f32 %v1274_v44, %v2668_v23  ;;  %v1283_v53 = vadd.f32 %v1275_v48, %v2675_v33  ;;  %v1284_v54 = vadd.f32 %v1276_v49, %v2671_v27 }
 0xea3   :  { %v1285_v0 = vmul.f32 %v1281_v51, %v2666_v20  ;;  %v1286_v55 = vmul.f32 %v1282_v52, %v2666_v20  ;;  %v1287_v56 = vmul.f32 %v1283_v53, %v2666_v20  ;;  %v1288_v57 = vmul.f32 %v1284_v54, %v2666_v20 }
 0xea5   :  { %2441 = vtanh.f32 %v1285_v0 }
 0xea6   :  { %2443 = vtanh.f32 %v1286_v55 }
 0xea7   :  { %2445 = vtanh.f32 %v1287_v56 }
 0xea8   :  { %2447 = vtanh.f32 %v1288_v57 }
 0xeb2   :  { %v2442_v58 = vpop.eup %2441 }
 0xeb3   :  { %v2444_v60 = vpop.eup %2443  ;;  %v1293_v1 = vmul.f32 %v2442_v58, %v2666_v20 }
 0xeb4   :  { %v2446_v36 = vpop.eup %2445  ;;  %v1294_v3 = vmul.f32 %v2444_v60, %v2666_v20 }
 0xeb5   :  { %v2448_v39 = vpop.eup %2447  ;;  %v1297_v17 = vadd.f32 %v1293_v1, %v2684_v40  ;;  %v1295_v11 = vmul.f32 %v2446_v36, %v2666_v20 }
 0xeb6   :  { %v1298_v41 = vadd.f32 %v1294_v3, %v2684_v40  ;;  %v1296_v10 = vmul.f32 %v2448_v39, %v2666_v20 }
 0xeb7   :  { %1321 = vrot.lane.b32.xlu1 %v1297_v17, %s2521_s5  ;;  %v1299_v13 = vadd.f32 %v1295_v11, %v2684_v40  ;;  %v1313_v28 = vmul.f32 %v1305_v26, %v1297_v17 }
 0xeb8   :  { %1323 = vrot.lane.b32.xlu0 %v1298_v41, %s2521_s5  ;;  %v1300_v14 = vadd.f32 %v1296_v10, %v2684_v40  ;;  %v1314_v29 = vmul.f32 %v1306_v9, %v1298_v41 }
 0xeb9   :  { %v1315_v61 = vmul.f32 %v1307_v31, %v1299_v13 }
 0xeba   :  { %v1316_v59 = vmul.f32 %v1308_v35, %v1300_v14 }
 0xebb   :  { %1325 = vrot.lane.b32.xlu1 %v1299_v13, %s2521_s5 }
 0xebc   :  { %1327 = vrot.lane.b32.xlu0 %v1300_v14, %s2521_s5 }
 0xf29   :  { %v1322_v15 = vpop.permute.xlu1 %1321 }
 0xf2a   :  { %v1324_v2 = vpop.permute.xlu0 %1323  ;;  %v1333_v16 = vmul.f32 %v1322_v15, %v1297_v17 }
 0xf2b   :  { %v1334_v21 = vmul.f32 %v1324_v2, %v1298_v41 }
 0xf2c   :  { %1341 = vrot.lane.b32.xlu1 %v1333_v16, %s2522_s19 }
 0xf2d   :  { %1343 = vrot.lane.b32.xlu0 %v1334_v21, %s2522_s19  ;;  %v1326_v22 = vpop.permute.xlu1 %1325 }
 0xf2e   :  { %v1328_v4 = vpop.permute.xlu0 %1327  ;;  %v1335_v25 = vmul.f32 %v1326_v22, %v1299_v13 }
 0xf2f   :  { %v1336_v7 = vmul.f32 %v1328_v4, %v1300_v14 }
 0xf30   :  { %1345 = vrot.lane.b32.xlu1 %v1335_v25, %s2522_s19 }
 0xf31   :  { %1347 = vrot.lane.b32.xlu0 %v1336_v7, %s2522_s19 }
 0xf9e   :  { %v1342_v30 = vpop.permute.xlu1 %1341 }
 0xf9f   :  { %v1344_v32 = vpop.permute.xlu0 %1343  ;;  %v3035_v34 = vadd.f32 %v1342_v30, %v1313_v28 }
 0xfa0   :  { %v3038_v37 = vadd.f32 %v1344_v32, %v1314_v29 }
 0xfa1   :  { %2449 = vtanh.f32 %v3035_v34 }
 0xfa2   :  { %2451 = vtanh.f32 %v3038_v37  ;;  %v1346_v19 = vpop.permute.xlu1 %1345 }
 0xfa3   :  { %v1348_v62 = vpop.permute.xlu0 %1347  ;;  %v3042_v63 = vadd.f32 %v1346_v19, %v1315_v61 }
 0xfa4   :  { %v3044_v8 = vadd.f32 %v1348_v62, %v1316_v59 }
 0xfa5   :  { %2453 = vtanh.f32 %v3042_v63 }
 0xfa6   :  { %2455 = vtanh.f32 %v3044_v8 }
 0xfae   :  { %v2450_v38 = vpop.eup %2449 }
 0xfaf   :  { %v2452_v45 = vpop.eup %2451  ;;  %1365 = vrot.lane.b32.xlu1 %v2450_v38, %s2521_s5 }
 0xfb0   :  { %1367 = vrot.lane.b32.xlu0 %v2452_v45, %s2521_s5 }
 0xfb2   :  { %v2454_v5 = vpop.eup %2453 }
 0xfb3   :  { %v2456_v24 = vpop.eup %2455  ;;  %1369 = vrot.lane.b32.xlu1 %v2454_v5, %s2521_s5 }
 0xfb4   :  { %1371 = vrot.lane.b32.xlu0 %v2456_v24, %s2521_s5 }
0x1021   :  { %v1366_v47 = vpop.permute.xlu1 %1365 }
0x1022   :  { %v1368_v44 = vpop.permute.xlu0 %1367  ;;  %v1377_v48 = vmul.f32 %v1366_v47, %v1297_v17 }
0x1023   :  { %v1378_v49 = vmul.f32 %v1368_v44, %v1298_v41 }
0x1024   :  { %v1401_v52 = vrot.slane %v1377_v48, 5 }
0x1025   :  { %v1385_v50 = vrot.slane %v1378_v49, 7  ;;  %v1402_v51 = vrot.slane %v1378_v49, 4  ;;  %v1370_v53 = vpop.permute.xlu1 %1369 }
0x1026   :  { %v1372_v54 = vpop.permute.xlu0 %1371  ;;  %v1379_v0 = vmul.f32 %v1370_v53, %v1299_v13 }
0x1027   :  { %v1386_v55 = vsel %vm977_vm12, %v1385_v50, %v1377_v48  ;;  %v3053_v56 = vmul.f32 %v1372_v54, %v1300_v14  ;;  %v1403_v1 = vsel %vm365_vm6, %v1402_v51, %v1401_v52  ;;  %v1515_v51 = vrot.slane %v3035_v34, 7 }
0x1028   :  { %v1387_v57 = vrot.slane %v1379_v0, 6  ;;  %v1404_v58 = vrot.slane %v1379_v0, 3  ;;  %v1516_v52 = vrot.slane %v3038_v37, 7 }
0x1029   :  { %v1406_v60 = vrot.slane %v3053_v56, 2 }
0x102a   :  { %v1405_v36 = vsel %vm368_vm7, %v1404_v58, %v1403_v1  ;;  %v3059_v3 = vsel %vm1183_vm13, %v1387_v57, %v1386_v55  ;;  %v1517_v55 = vrot.slane %v3042_v63, 7 }
0x102b   :  { %v1407_v39 = vsel %vm371_vm8, %v1406_v60, %v1405_v36  ;;  %v1518_v60 = vrot.slane %v3044_v8, 7 }
0x102c   :  { %1408 = vrot.lane.b32.xlu1 %v1407_v39, %s2522_s19 }
0x109e   :  { %v1409_v17 = vpop.permute.xlu1 %1408 }
0x109f   :  { %2321 = vmatmul.mubr.msk.f32.vlgmr.msra.gmra.mxu1 %vm174_vm2, %v1409_v17 }
0x115f   :  { %v1478_v11 = vpop.f32.mrf.mxu1 }
0x1160   :  { %v1483_v41 = vrot.slane %v1478_v11, 2  ;;  %v1484_v10 = vrot.slane %v1478_v11, 3  ;;  %v1485_v13 = vrot.slane %v1478_v11, 4  ;;  %v1486_v14 = vrot.slane %v1478_v11, 5 }
0x1161   :  { %v2322_v15 = vpop.f32.mrf.mxu1 }
0x1162   :  { %v1491_v2 = vadd.f32 %v1483_v41, %v2662_v18  ;;  %v1492_v16 = vadd.f32 %v1484_v10, %v2668_v23  ;;  %v1493_v21 = vadd.f32 %v1485_v13, %v2675_v33  ;;  %v1494_v22 = vadd.f32 %v1486_v14, %v2671_v27 }
0x1164   :  { %v1495_v4 = vmul.f32 %v1491_v2, %v2666_v20  ;;  %v1496_v25 = vmul.f32 %v1492_v16, %v2666_v20  ;;  %v1497_v7 = vmul.f32 %v1493_v21, %v2666_v20  ;;  %v1498_v26 = vmul.f32 %v1494_v22, %v2666_v20 }
0x1166   :  { %2457 = vtanh.f32 %v1495_v4 }
0x1167   :  { %2459 = vtanh.f32 %v1496_v25 }
0x1168   :  { %2461 = vtanh.f32 %v1497_v7 }
0x1169   :  { %2463 = vtanh.f32 %v1498_v26 }
0x1173   :  { %v2458_v9 = vpop.eup %2457 }
0x1174   :  { %v2460_v28 = vpop.eup %2459  ;;  %v1503_v29 = vmul.f32 %v2458_v9, %v2666_v20 }
0x1175   :  { %v2462_v30 = vpop.eup %2461  ;;  %v1504_v31 = vmul.f32 %v2460_v28, %v2666_v20 }
0x1176   :  { %v2464_v32 = vpop.eup %2463  ;;  %v1507_v35 = vadd.f32 %v1503_v29, %v2684_v40  ;;  %v1505_v61 = vmul.f32 %v2462_v30, %v2666_v20 }
0x1177   :  { %v1508_v59 = vadd.f32 %v1504_v31, %v2684_v40  ;;  %v1506_v19 = vmul.f32 %v2464_v32, %v2666_v20 }
0x1178   :  { %1531 = vrot.lane.b32.xlu0 %v1507_v35, %s2521_s5  ;;  %v1509_v62 = vadd.f32 %v1505_v61, %v2684_v40  ;;  %v1523_v53 = vmul.f32 %v1515_v51, %v1507_v35 }
0x1179   :  { %1533 = vrot.lane.b32.xlu1 %v1508_v59, %s2521_s5  ;;  %v1510_v38 = vadd.f32 %v1506_v19, %v2684_v40  ;;  %v1524_v54 = vmul.f32 %v1516_v52, %v1508_v59 }
0x117a   :  { %v1525_v36 = vmul.f32 %v1517_v55, %v1509_v62 }
0x117b   :  { %v1526_v34 = vmul.f32 %v1518_v60, %v1510_v38 }
0x117c   :  { %1535 = vrot.lane.b32.xlu0 %v1509_v62, %s2521_s5 }
0x117d   :  { %1537 = vrot.lane.b32.xlu1 %v1510_v38, %s2521_s5 }
0x11ea   :  { %v1532_v45 = vpop.permute.xlu0 %1531 }
0x11eb   :  { %v1534_v5 = vpop.permute.xlu1 %1533  ;;  %v1543_v24 = vmul.f32 %v1532_v45, %v1507_v35 }
0x11ec   :  { %v1544_v47 = vmul.f32 %v1534_v5, %v1508_v59 }
0x11ed   :  { %1551 = vrot.lane.b32.xlu0 %v1543_v24, %s2522_s19 }
0x11ee   :  { %1553 = vrot.lane.b32.xlu1 %v1544_v47, %s2522_s19  ;;  %v1536_v44 = vpop.permute.xlu0 %1535 }
0x11ef   :  { %v1538_v48 = vpop.permute.xlu1 %1537  ;;  %v1545_v49 = vmul.f32 %v1536_v44, %v1509_v62 }
0x11f0   :  { %v1546_v50 = vmul.f32 %v1538_v48, %v1510_v38 }
0x11f1   :  { %1555 = vrot.lane.b32.xlu0 %v1545_v49, %s2522_s19 }
0x11f2   :  { %1557 = vrot.lane.b32.xlu1 %v1546_v50, %s2522_s19 }
0x125f   :  { %v1552_v0 = vpop.permute.xlu0 %1551 }
0x1260   :  { %v1554_v57 = vpop.permute.xlu1 %1553  ;;  %v3091_v58 = vadd.f32 %v1552_v0, %v1523_v53 }
0x1261   :  { %v3094_v1 = vadd.f32 %v1554_v57, %v1524_v54 }
0x1262   :  { %2465 = vtanh.f32 %v3091_v58 }
0x1263   :  { %2467 = vtanh.f32 %v3094_v1  ;;  %v1556_v39 = vpop.permute.xlu0 %1555 }
0x1264   :  { %v1558_v37 = vpop.permute.xlu1 %1557  ;;  %v3098_v17 = vadd.f32 %v1556_v39, %v1525_v36 }
0x1265   :  { %v3100_v11 = vadd.f32 %v1558_v37, %v1526_v34 }
0x1266   :  { %2469 = vtanh.f32 %v3098_v17 }
0x1267   :  { %2471 = vtanh.f32 %v3100_v11 }
0x126f   :  { %v2466_v63 = vpop.eup %2465 }
0x1270   :  { %v2468_v8 = vpop.eup %2467  ;;  %1575 = vrot.lane.b32.xlu0 %v2466_v63, %s2521_s5 }
0x1271   :  { %1577 = vrot.lane.b32.xlu1 %v2468_v8, %s2521_s5 }
0x1273   :  { %v2470_v41 = vpop.eup %2469 }
0x1274   :  { %v2472_v10 = vpop.eup %2471  ;;  %1579 = vrot.lane.b32.xlu0 %v2470_v41, %s2521_s5 }
0x1275   :  { %1581 = vrot.lane.b32.xlu1 %v2472_v10, %s2521_s5 }
0x12e2   :  { %v1576_v13 = vpop.permute.xlu0 %1575 }
0x12e3   :  { %v1578_v14 = vpop.permute.xlu1 %1577  ;;  %v1587_v15 = vmul.f32 %v1576_v13, %v1507_v35 }
0x12e4   :  { %v1588_v2 = vmul.f32 %v1578_v14, %v1508_v59 }
0x12e5   :  { %v1611_v22 = vrot.slane %v1587_v15, 6 }
0x12e6   :  { %v1595_v16 = vrot.slane %v1588_v2, 7  ;;  %v1612_v21 = vrot.slane %v1588_v2, 5  ;;  %v1580_v4 = vpop.permute.xlu0 %1579  ;;  %v1727_v2 = vrot.slane %v3098_v17, 7 }
0x12e7   :  { %v1582_v25 = vpop.permute.xlu1 %1581  ;;  %v1589_v7 = vmul.f32 %v1580_v4, %v1509_v62  ;;  %v1728_v4 = vrot.slane %v3100_v11, 7 }
0x12e8   :  { %v1590_v26 = vmul.f32 %v1582_v25, %v1510_v38  ;;  %v3109_v9 = vsel %vm1183_vm13, %v1595_v16, %v1587_v15  ;;  %v1613_v32 = vsel %vm365_vm6, %v1612_v21, %v1611_v22  ;;  %v1726_v15 = vrot.slane %v3094_v1, 7 }
0x12e9   :  { %v1597_v28 = vrot.slane %v1589_v7, 6  ;;  %v1614_v29 = vrot.slane %v1589_v7, 4 }
0x12ea   :  { %v1598_v30 = vrot.slane %v1590_v26, 5  ;;  %v1616_v31 = vrot.slane %v1590_v26, 3  ;;  %v1725_v26 = vrot.slane %v3091_v58, 7 }
0x12eb   :  { %v1615_v61 = vsel %vm368_vm7, %v1614_v29, %v1613_v32 }
0x12ec   :  { %v1617_v35 = vsel %vm371_vm8, %v1616_v31, %v1615_v61  ;;  %v3115_v59 = vsel %vm365_vm6, %v1598_v30, %v1597_v28 }
0x12ed   :  { %1618 = vrot.lane.b32.xlu0 %v1617_v35, %s2522_s19 }
0x135f   :  { %v1619_v19 = vpop.permute.xlu0 %1618 }
0x1360   :  { %2332 = vmatmul.mubr.msk.f32.vlgmr.msra.gmra.mxu0 %vm174_vm2, %v1619_v19 }
0x1420   :  { %v1688_v62 = vpop.f32.mrf.mxu0 }
0x1421   :  { %v1693_v38 = vrot.slane %v1688_v62, 1  ;;  %v1694_v45 = vrot.slane %v1688_v62, 2  ;;  %v1695_v5 = vrot.slane %v1688_v62, 3  ;;  %v1696_v24 = vrot.slane %v1688_v62, 4 }
0x1422   :  { %v2333_v47 = vpop.f32.mrf.mxu0 }
0x1423   :  { %v1701_v44 = vadd.f32 %v1693_v38, %v2662_v18  ;;  %v1702_v48 = vadd.f32 %v1694_v45, %v2668_v23  ;;  %v1703_v49 = vadd.f32 %v1695_v5, %v2675_v33  ;;  %v1704_v50 = vadd.f32 %v1696_v24, %v2671_v27  ;;  %v53_v45 = vld [vmem:[%s3328_s6 + $0x18] sm:$0xff]  ;;  %v52_v24 = vld [vmem:[%s3328_s6 + $0x10] sm:$0xff] }
0x1424   :  { %2334 = vmatprep.subr.mxu1 %v53_v45 }
0x1425   :  { %v1705_v51 = vmul.f32 %v1701_v44, %v2666_v20  ;;  %v1706_v52 = vmul.f32 %v1702_v48, %v2666_v20  ;;  %v1707_v53 = vmul.f32 %v1703_v49, %v2666_v20  ;;  %v1708_v54 = vmul.f32 %v1704_v50, %v2666_v20  ;;  %2335 = vmatpush3.msra.mxu1 %v53_v45  ;;  %v51_v44 = vld [vmem:[%s3328_s6 + $0x8] sm:$0xff]  ;;  %v50_v48 = vld [vmem:[%s3328_s6] sm:$0xff]  ;;  %s2523_s6 = smov 96  }
0x1426   :  { %2336 = vmatprep.subr.mxu1 %v52_v24  ;;  %v1389_v49 = vrot.slane %v3053_v56, 5 }
0x1427   :  { %2473 = vtanh.f32 %v1705_v51  ;;  %2337 = vmatpush3.msra.mxu1 %v52_v24 }
0x1428   :  { %2475 = vtanh.f32 %v1706_v52  ;;  %2338 = vmatprep.subr.mxu1 %v51_v44 }
0x1429   :  { %2477 = vtanh.f32 %v1707_v53  ;;  %2339 = vmatpush3.msra.mxu1 %v51_v44 }
0x142a   :  { %2479 = vtanh.f32 %v1708_v54  ;;  %2340 = vmatprep.subr.mxu1 %v50_v48 }
0x142b   :  { %2341 = vmatpush3.msra.mxu1 %v50_v48 }
0x1434   :  { %v2474_v0 = vpop.eup %2473 }
0x1435   :  { %v2476_v18 = vpop.eup %2475  ;;  %v1713_v34 = vmul.f32 %v2474_v0, %v2666_v20 }
0x1436   :  { %v2478_v55 = vpop.eup %2477  ;;  %v1714_v23 = vmul.f32 %v2476_v18, %v2666_v20 }
0x1437   :  { %v2480_v33 = vpop.eup %2479  ;;  %v1715_v27 = vmul.f32 %v2478_v55, %v2666_v20  ;;  %v3145_v37 = vadd.f32 %v1713_v34, %v2684_v40 }
0x1438   :  { %v3130_v57 = vadd.f32 %v1714_v23, %v2684_v40  ;;  %v1716_v60 = vmul.f32 %v2480_v33, %v2666_v20 }
0x1439   :  { %v3134_v36 = vadd.f32 %v1715_v27, %v2684_v40  ;;  %v1733_v17 = vmul.f32 %v1725_v26, %v3145_v37 }
0x143a   :  { %1743 = vrot.lane.b32.xlu1 %v3130_v57, %s2521_s5  ;;  %v3142_v39 = vadd.f32 %v1716_v60, %v2684_v40  ;;  %v1734_v16 = vmul.f32 %v1726_v15, %v3130_v57  ;;  %v1969_v15 = vshrl.u32 %v165_v12, 7 }
0x143b   :  { %1745 = vrot.lane.b32.xlu0 %v3134_v36, %s2521_s5  ;;  %v1735_v22 = vmul.f32 %v1727_v2, %v3134_v36 }
0x143c   :  { %v1736_v30 = vmul.f32 %v1728_v4, %v3142_v39  ;;  %v3233_v4 = vsub.s32 2, %v1969_v15 }
0x143e   :  { %1747 = vrot.lane.b32.xlu1 %v3142_v39, %s2521_s5 }
0x143f   :  { %1741 = vrot.lane.b32.xlu0 %v3145_v37, %s2521_s5 }
0x14ac   :  { %v1744_v63 = vpop.permute.xlu1 %1743 }
0x14ad   :  { %v1746_v20 = vpop.permute.xlu0 %1745  ;;  %v1754_v8 = vmul.f32 %v1744_v63, %v3130_v57 }
0x14ae   :  { %v1755_v41 = vmul.f32 %v1746_v20, %v3134_v36 }
0x14af   :  { %1763 = vrot.lane.b32.xlu1 %v1754_v8, %s2522_s19 }
0x14b0   :  { %1765 = vrot.lane.b32.xlu0 %v1755_v41, %s2522_s19  ;;  %v1748_v10 = vpop.permute.xlu1 %1747 }
0x14b1   :  { %v1756_v40 = vmul.f32 %v1748_v10, %v3142_v39  ;;  %v1742_v13 = vpop.permute.xlu0 %1741 }
0x14b2   :  { %v1753_v14 = vmul.f32 %v1742_v13, %v3145_v37  ;;  %v2171_v13 = vld [vmem:[%s3329_s7] ss:$0 sm:$0xff] }
0x14b3   :  { %1767 = vrot.lane.b32.xlu1 %v1756_v40, %s2522_s19 }
0x14b4   :  { %1761 = vrot.lane.b32.xlu0 %v1753_v14, %s2522_s19 }
0x1521   :  { %v1764_v21 = vpop.permute.xlu1 %1763 }
0x1522   :  { %v1774_v25 = vadd.f32 %v1764_v21, %v1734_v16  ;;  %v1766_v7 = vpop.permute.xlu0 %1765  ;;  %v3229_v16 = vsub.s32 0, %v1969_v15 }
0x1523   :  { %v1775_v28 = vadd.f32 %v1766_v7, %v1735_v22  ;;  %v3231_v22 = vsub.s32 1, %v1969_v15 }
0x1524   :  { %2481 = vtanh.f32 %v1774_v25  ;;  %v1827_v29 = vrot.slane %v1774_v25, 7  ;;  %v3235_v25 = vsub.s32 3, %v1969_v15 }
0x1525   :  { %2483 = vtanh.f32 %v1775_v28  ;;  %v1828_v1 = vrot.slane %v1775_v28, 6  ;;  %v1768_v31 = vpop.permute.xlu1 %1767 }
0x1526   :  { %v1776_v32 = vadd.f32 %v1768_v31, %v1736_v30  ;;  %v1762_v61 = vpop.permute.xlu0 %1761 }
0x1527   :  { %v1773_v35 = vadd.f32 %v1762_v61, %v1733_v17  ;;  %v1829_v19 = vsel %vm365_vm6, %v1828_v1, %v1827_v29 }
0x1528   :  { %2485 = vtanh.f32 %v1776_v32  ;;  %v1830_v11 = vrot.slane %v1776_v32, 5 }
0x1529   :  { %2487 = vtanh.f32 %v1773_v35 }
0x152a   :  { %v1831_v58 = vsel %vm368_vm7, %v1830_v11, %v1829_v19 }
0x1531   :  { %v2482_v62 = vpop.eup %2481 }
0x1532   :  { %v2484_v38 = vpop.eup %2483  ;;  %1787 = vrot.lane.b32.xlu1 %v2482_v62, %s2521_s5 }
0x1533   :  { %1789 = vrot.lane.b32.xlu0 %v2484_v38, %s2521_s5 }
0x1535   :  { %v2486_v5 = vpop.eup %2485 }
0x1536   :  { %v2488_v47 = vpop.eup %2487  ;;  %1791 = vrot.lane.b32.xlu1 %v2486_v5, %s2521_s5 }
0x1537   :  { %1785 = vrot.lane.b32.xlu0 %v2488_v47, %s2521_s5 }
0x153a   :  { %569 = vrot.lane.b32.xlu1 %v2797_v6, %s2522_s19 }
0x153b   :  { %774 = vrot.lane.b32.xlu0 %v2861_v43, %s2522_s19 }
0x153e   :  { %979 = vrot.lane.b32.xlu1 %v2924_v46, %s2522_s19 }
0x153f   :  { %1185 = vrot.lane.b32.xlu0 %v2987_v42, %s2522_s19 }
0x1542   :  { %1390 = vrot.lane.b32.xlu1 %v3059_v3, %s2522_s19 }
0x1543   :  { %1392 = vrot.lane.b32.xlu0 %v1389_v49, %s2522_s19 }
0x1546   :  { %1600 = vrot.lane.b32.xlu1 %v3109_v9, %s2522_s19 }
0x1547   :  { %1602 = vrot.lane.b32.xlu0 %v3115_v59, %s2522_s19 }
0x15a4   :  { %v1788_v6 = vpop.permute.xlu1 %1787 }
0x15a5   :  { %v1798_v43 = vmul.f32 %v1788_v6, %v3130_v57  ;;  %v1790_v46 = vpop.permute.xlu0 %1789 }
0x15a6   :  { %v1799_v50 = vmul.f32 %v1790_v46, %v3134_v36 }
0x15a7   :  { %v1805_v42 = vrot.slane %v1798_v43, 7 }
0x15a8   :  { %v1806_v51 = vrot.slane %v1799_v50, 6  ;;  %v1792_v56 = vpop.permute.xlu1 %1791 }
0x15a9   :  { %v1800_v52 = vmul.f32 %v1792_v56, %v3142_v39  ;;  %v1786_v3 = vpop.permute.xlu0 %1785 }
0x15aa   :  { %v1797_v53 = vmul.f32 %v1786_v3, %v3145_v37  ;;  %v1807_v9 = vsel %vm365_vm6, %v1806_v51, %v1805_v42 }
0x15ab   :  { %v1808_v54 = vrot.slane %v1800_v52, 5 }
0x15ac   :  { %1810 = vrot.lane.b32.xlu1 %v1797_v53, %s2522_s19  ;;  %v570_v59 = vpop.permute.xlu1 %569 }
0x15ad   :  { %574 = vst.msk [vmem:[#allocation2 + $0x3] sm:$0x1e] %vm573_vm14, %v570_v59  ;;  %v775_v0 = vpop.permute.xlu0 %774  ;;  %v1809_v18 = vsel %vm368_vm7, %v1808_v54, %v1807_v9  ;;  %vm1817_vm14 = vcmask 261127  }
0x15ae   :  { %779 = vst.msk [vmem:[#allocation2 + $0x6] sm:$0x3c] %vm778_vm15, %v775_v0  ;;  %1812 = vrot.lane.b32.xlu0 %v1809_v18, %s2522_s19  ;;  %vm1819_vm15 = vcmask 256000  }
0x15b0   :  { %1832 = vrot.lane.b32.xlu1 %v1773_v35, %s2523_s6  ;;  %v980_v55 = vpop.permute.xlu1 %979 }
0x15b1   :  { %984 = vst.msk [vmem:[#allocation2 + $0x9] sm:$0x78] %vm983_vm0, %v980_v55  ;;  %v1186_v23 = vpop.permute.xlu0 %1185  ;;  %vm2098_vm0 = vcmask 9216  }
0x15b2   :  { %1190 = vst.msk [vmem:[#allocation2 + $0xc] sm:$0xf0] %vm1189_vm1, %v1186_v23  ;;  %1834 = vrot.lane.b32.xlu0 %v1831_v58, %s2523_s6  ;;  %vm2141_vm1 = vcmask 15363  }
0x15b4   :  { %v1391_v33 = vpop.permute.xlu1 %1390  ;;  %v2357_v27 = vld [vmem:[#allocation2] sm:$0xff]  }
0x15b5   :  { %1398 = vst.msk [vmem:[#allocation2 + $0xf] sm:$0xe0] %vm1397_vm3, %v1391_v33  ;;  %v1393_v57 = vpop.permute.xlu0 %1392  ;;  %2342 = vmatprep.mubr.msk.f32.mxu1 %vm174_vm2, %v2357_v27  ;;  %vm2096_vm3 = vcmask 15362  }
0x15b6   :  { %1400 = vst.msk [vmem:[#allocation2 + $0x17] sm:$0x1] %vm1399_vm4, %v1393_v57  ;;  %vm2008_vm4 = vcmask 15360  }
0x15b8   :  { %v1601_v60 = vpop.permute.xlu1 %1600  ;;  %v2358_v36 = vld [vmem:[#allocation2 + $0x8] sm:$0xff]  }
0x15b9   :  { %1608 = vst.msk [vmem:[#allocation2 + $0x12] sm:$0xc0] %vm1607_vm5, %v1601_v60  ;;  %v1603_v34 = vpop.permute.xlu0 %1602  ;;  %2343 = vmatmul.mubr.msk.f32.vlgmr.msra.gmra.mxu1 %vm174_vm2, %v2358_v36  ;;  %vm2051_vm5 = vcmask 15361  }
0x15ba   :  { %1610 = vst.msk [vmem:[#allocation2 + $0x1a] sm:$0x3] %vm1609_vm9, %v1603_v34  ;;  %vm2143_vm9 = vcmask 10240  }
0x15bd   :  { %v2359_v39 = vld [vmem:[#allocation2 + $0x10] sm:$0xff]  }
0x15be   :  { %2345 = vmatprep.mubr.msk.f32.mxu1 %vm174_vm2, %v2359_v39 }
0x161e   :  { %v1811_v37 = vpop.permute.xlu1 %1810 }
0x161f   :  { %1818 = vst.msk [vmem:[#allocation2 + $0x15] sm:$0x80] %vm1817_vm14, %v1811_v37  ;;  %1821 = vst.msk [vmem:[%s3331_s9 - $0x7] sm:$0x80] %vm1817_vm14, %v1811_v37 }
0x1620   :  { %v1813_v63 = vpop.permute.xlu0 %1812 }
0x1621   :  { %1820 = vst.msk [vmem:[#allocation2 + $0x1d] sm:$0x7] %vm1819_vm15, %v1813_v63  ;;  %1822 = vst.msk [vmem:[%s3331_s9 + $0x1] sm:$0x7] %vm1819_vm15, %v1813_v63 }
0x1622   :  { %v1833_v20 = vpop.permute.xlu1 %1832 }
0x1623   :  { %1838 = vst.msk [vmem:[%s3332_s10 - $0x7] sm:$0x80] %vm1817_vm14, %v1833_v20 }
0x1624   :  { %v1835_v8 = vpop.permute.xlu0 %1834 }
0x1625   :  { %1839 = vst.msk [vmem:[%s3332_s10 + $0x1] sm:$0x7] %vm1819_vm15, %v1835_v8 }
0x1628   :  { %v2360_v41 = vld [vmem:[#allocation2 + $0x18] sm:$0xff]  }
0x1629   :  { %2346 = vmatmul.mubr.msk.f32.gmra.mxu1 %vm174_vm2, %v2360_v41  ;;  %vm2053_vm2 = vcmask 8192  }
0x1679   :  { %v2344_v10 = vpop.f32.mrf.mxu1 }
0x167a   :  { %v1947_v21 = vadd.f32 %v2344_v10, %v2171_v13 }
0x167b   :  { %v1941_v40 = vpop.f32.mrf.mxu1 }
0x167c   :  { %v1942_v14 = vadd.f32 %v2171_v13, %v1941_v40  ;;  %v1965_v30 = vcombine.high %v1947_v21, %v1947_v21  ;;  %v1979_v61 = vrot.slane %v1947_v21, %v3229_v16  ;;  %v2021_v58 = vrot.slane %v1947_v21, %v3231_v22 }
0x167d   :  { %v2066_v62 = vrot.slane %v1947_v21, %v3233_v4  ;;  %v2111_v38 = vrot.slane %v1947_v21, %v3235_v25 }
0x167e   :  { %v1964_v2 = vcombine.high %v1942_v14, %v1942_v14  ;;  %v1971_v12 = vrot.slane %v1942_v14, %v3229_v16  ;;  %v2013_v1 = vrot.slane %v1942_v14, %v3231_v22  ;;  %v2058_v31 = vrot.slane %v1942_v14, %v3233_v4 }
0x167f   :  { %v2103_v17 = vrot.slane %v1942_v14, %v3235_v25  ;;  %v1983_v45 = vrot.slane %v1965_v30, %v3229_v16  ;;  %v2025_v6 = vrot.slane %v1965_v30, %v3231_v22  ;;  %v2070_v43 = vrot.slane %v1965_v30, %v3233_v4 }
0x1680   :  { %v1975_v7 = vrot.slane %v1964_v2, %v3229_v16  ;;  %v2017_v26 = vrot.slane %v1964_v2, %v3231_v22  ;;  %v2062_v28 = vrot.slane %v1964_v2, %v3233_v4  ;;  %v2107_v29 = vrot.slane %v1964_v2, %v3235_v25 }
0x1681   :  { %v2115_v46 = vrot.slane %v1965_v30, %v3235_v25 }
0x1682   :  { %v2000_v32 = vsel %vm365_vm6, %v1975_v7, %v1971_v12  ;;  %v2042_v35 = vsel %vm368_vm7, %v2017_v26, %v2013_v1  ;;  %v2087_v19 = vsel %vm371_vm8, %v2062_v28, %v2058_v31  ;;  %v2132_v11 = vsel %vm567_vm10, %v2107_v29, %v2103_v17 }
0x1683   :  { %v2001_v5 = vsel %vm368_vm7, %v1979_v61, %v2000_v32  ;;  %v2043_v47 = vsel %vm371_vm8, %v2021_v58, %v2042_v35  ;;  %v2088_v44 = vsel %vm567_vm10, %v2066_v62, %v2087_v19  ;;  %v2133_v48 = vsel %vm772_vm11, %v2111_v38, %v2132_v11 }
0x1684   :  { %v2002_v51 = vsel %vm371_vm8, %v1983_v45, %v2001_v5  ;;  %v2044_v52 = vsel %vm567_vm10, %v2025_v6, %v2043_v47  ;;  %v2089_v3 = vsel %vm772_vm11, %v2070_v43, %v2088_v44  ;;  %v2134_v53 = vsel %vm977_vm12, %v2115_v46, %v2133_v48 }
0x16e9   :  { %v2347_v24 = vpop.f32.mrf.mxu1 }
0x16ea   :  { %v1957_v49 = vadd.f32 %v2347_v24, %v2171_v13 }
0x16eb   :  { %v1951_v50 = vpop.f32.mrf.mxu1 }
0x16ec   :  { %v1967_v42 = vcombine.high %v1957_v49, %v1957_v49  ;;  %v1952_v56 = vadd.f32 %v2171_v13, %v1951_v50  ;;  %v1995_v54 = vrot.slane %v1957_v49, %v3229_v16  ;;  %v2082_v59 = vrot.slane %v1957_v49, %v3233_v4 }
0x16ed   :  { %v2037_v27 = vrot.slane %v1957_v49, %v3231_v22  ;;  %v2127_v60 = vrot.slane %v1957_v49, %v3235_v25 }
0x16ee   :  { %v2041_v9 = vrot.slane %v1967_v42, %v3231_v22  ;;  %v2086_v0 = vrot.slane %v1967_v42, %v3233_v4  ;;  %v1966_v18 = vcombine.high %v1952_v56, %v1952_v56  ;;  %v1987_v55 = vrot.slane %v1952_v56, %v3229_v16 }
0x16ef   :  { %v2029_v23 = vrot.slane %v1952_v56, %v3231_v22  ;;  %v2074_v33 = vrot.slane %v1952_v56, %v3233_v4  ;;  %v2119_v36 = vrot.slane %v1952_v56, %v3235_v25  ;;  %v1999_v40 = vrot.slane %v1967_v42, %v3229_v16 }
0x16f0   :  { %2177 = vst.msk [vmem:[%s3330_s8 + $0xf] sm:$0x1] %vm2053_vm2, %v2041_v9  ;;  %v2092_v57 = vsel %vm365_vm6, %v2086_v0, %v2082_v59  ;;  %v1991_v34 = vrot.slane %v1966_v18, %v3229_v16  ;;  %v2003_v39 = vsel %vm567_vm10, %v1987_v55, %v2002_v51  ;;  %v2033_v37 = vrot.slane %v1966_v18, %v3231_v22 }
0x16f1   :  { %2179 = vst.msk [vmem:[%s3330_s8 + $0x16] sm:$0x3] %vm2098_vm0, %v2092_v57  ;;  %v2045_v63 = vsel %vm772_vm11, %v2029_v23, %v2044_v52  ;;  %v2078_v20 = vrot.slane %v1966_v18, %v3233_v4  ;;  %v2090_v8 = vsel %vm977_vm12, %v2074_v33, %v2089_v3  ;;  %v2123_v41 = vrot.slane %v1966_v18, %v3235_v25 }
0x16f2   :  { %v2135_v10 = vsel %vm1183_vm13, %v2119_v36, %v2134_v53  ;;  %v2131_v13 = vrot.slane %v1967_v42, %v3235_v25  ;;  %v2004_v14 = vsel %vm772_vm11, %v1991_v34, %v2003_v39  ;;  %v2046_v15 = vsel %vm977_vm12, %v2033_v37, %v2045_v63 }
0x16f3   :  { %2180 = vst.msk [vmem:[%s3330_s8 + $0x15] sm:$0xf8] %vm2141_vm1, %v2135_v10  ;;  %v2005_v2 = vsel %vm977_vm12, %v1995_v54, %v2004_v14  ;;  %v2047_v21 = vsel %vm1183_vm13, %v2037_v27, %v2046_v15  ;;  %v2091_v22 = vsel %vm1183_vm13, %v2078_v20, %v2090_v8  ;;  %v2136_v4 = vsel %vm365_vm6, %v2127_v60, %v2123_v41 }
0x16f4   :  { %v2006_v16 = vsel %vm1183_vm13, %v1999_v40, %v2005_v2  ;;  %2176 = vst.msk [vmem:[%s3330_s8 + $0x7] sm:$0xfe] %vm2051_vm5, %v2047_v21  ;;  %v2137_v25 = vsel %vm368_vm7, %v2131_v13, %v2136_v4 }
0x16f5   :  { %2178 = vst.msk [vmem:[%s3330_s8 + $0xe] sm:$0xfc] %vm2096_vm3, %v2091_v22 }
0x16f6   :  { %2009 = vst.msk [vmem:[%s3330_s8] sm:$0xff] %vm2008_vm4, %v2006_v16 }
0x16f7   :  { %2181 = vst.msk [vmem:[%s3330_s8 + $0x1d] sm:$0x7] %vm2143_vm9, %v2137_v25 }
0x16f8   :  { %2157 = vsyncpa [#allocation4], 1 }

</bundles_post_ra>
